<compile_context>
chip_gen: v7x
topology: tpu7x:2x2x1
jax: 0.10.0
libtpu: 0.0.40
codegen_flags: <defaults>
</compile_context>

<pallas_src>
import jax
import jax.numpy as jnp
from jax import lax
from jax.experimental import pallas as pl
from jax.experimental.pallas import tpu as pltpu


def attention_kernel(x_ref, w_ref, b_ref, u_ref, o_ref):
    bb, t, d = x_ref.shape                       # static block dims
    a = w_ref.shape[1]

    x = x_ref[...]                               # [BB, T, D] f32

    # One big MXU matmul over the flattened (BB*T) rows, exact f32 precision.
    # (T % 8 == 0 keeps this reshape a free, tile-aligned view.)
    x2 = x.reshape(bb * t, d)
    pre = jnp.dot(x2, w_ref[...],
                  preferred_element_type=jnp.float32,
                  precision=lax.Precision.HIGHEST) + b_ref[...]
    v = jnp.tanh(pre)                            # [BB*T, A]

    # vu in a lane-dense [BB, T] layout (no trailing-1 intermediates).
    v3 = v.reshape(bb, t, a)                     # free view for T % 8 == 0
    u = u_ref[...]                               # (1, A)
    vu = jnp.sum(v3 * u[None, :, :], axis=-1)    # [BB, T]

    # Softmax over the time axis (max-subtracted: identical math, no overflow).
    vu = vu - jnp.max(vu, axis=1, keepdims=True)
    exps = jnp.exp(vu)                           # [BB, T]
    denom = jnp.sum(exps, axis=1, keepdims=True) # [BB, 1]
    alphas = exps / denom                        # [BB, T]  (exact divide)

    # Attention-weighted sum over time bins; single broadcast back to 3D.
    out = jnp.sum(x * alphas[:, :, None], axis=1)          # [BB, D]
    o_ref[...] = out.astype(o_ref.dtype)


def _choose_block_b(batch, time_bins, feat, itemsize, target_bytes):
    """Batch rows per grid step, sized by VMEM bytes (not MXU rows)."""
    rows = max(8, int(target_bytes) // max(1, time_bins * feat * itemsize))
    rows = max(8, (rows // 8) * 8)               # sublane-dense output stores
    if batch <= rows:
        # Tiny batch: one grid step covering the whole (padded) batch.
        return max(8, ((batch + 7) // 8) * 8)
    # Large batch: keep >= 4 blocks so both TCs (v7x megacore) get >= 2
    # pipelined steps each.
    while batch < 4 * rows and rows > 64:
        rows = max(64, ((rows // 2) // 8) * 8)
    return rows


def attention_layer(x, w, b, u, *, block_b=None, target_block_bytes=2 << 20):
    """x: [B, T, 2H], w: [2H, A], b: [A], u: [A]  ->  [B, 2H]."""
    B, T, D = x.shape
    A = w.shape[1]

    if block_b is None:
        block_b = _choose_block_b(B, T, D, x.dtype.itemsize, target_block_bytes)
    block_b = max(1, int(block_b))

    # Pad batch to a multiple of block_b (zero rows are harmless: their softmax
    # is finite and their weighted sum is 0; they are sliced off below).
    n_blk = pl.cdiv(B, block_b)
    Bp = n_blk * block_b
    if Bp != B:
        x = jnp.pad(x, ((0, Bp - B), (0, 0), (0, 0)))

    b2 = b.reshape(1, A)
    u2 = u.reshape(1, A)

    out = pl.pallas_call(
        attention_kernel,
        out_shape=jax.ShapeDtypeStruct((Bp, D), x.dtype),
        grid=(n_blk,),
        in_specs=[
            pl.BlockSpec((block_b, T, D), lambda i: (i, 0, 0)),  # x: batch block
            pl.BlockSpec((D, A), lambda i: (0, 0)),              # W: resident
            pl.BlockSpec((1, A), lambda i: (0, 0)),              # b: resident
            pl.BlockSpec((1, A), lambda i: (0, 0)),              # u: resident
        ],
        out_specs=pl.BlockSpec((block_b, D), lambda i: (i, 0)),
        compiler_params=pltpu.CompilerParams(
            dimension_semantics=("parallel",),
        ),
    )(x, w, b2, u2)

    return out[:B]


def ref_forward(x, w, b, u):
    """Pure-JAX reference matching the PyTorch forward (high-precision dots)."""
    B, T, D = x.shape
    v = jnp.tanh(
        jnp.dot(x.reshape(-1, D), w, precision=lax.Precision.HIGHEST)
        + b.reshape(1, -1)
    )
    vu = jnp.dot(v, u.reshape(-1, 1), precision=lax.Precision.HIGHEST)
    exps = jnp.exp(vu).reshape(-1, T)
    alphas = exps / jnp.sum(exps, axis=1, keepdims=True)
    return jnp.sum(x * alphas.reshape(-1, T, 1), axis=1)


if __name__ == "__main__":
    hidden_size = 64          # -> feature dim 2H = 128
    time_bins = 8
    attention_size = 128
    batch = 32

    key = jax.random.PRNGKey(0)
    kx, kw, kb, ku = jax.random.split(key, 4)

    x = jax.random.normal(kx, (batch, time_bins, 2 * hidden_size), dtype=jnp.float32)
    attweight_w = jax.random.normal(kw, (2 * hidden_size, attention_size), dtype=jnp.float32)
    attweight_b = jax.random.normal(kb, (attention_size,), dtype=jnp.float32)
    attweight_u = jax.random.normal(ku, (attention_size,), dtype=jnp.float32)

    expected = ref_forward(x, attweight_w, attweight_b, attweight_u)

    # 1) Default block sizing: whole batch in a single grid step.
    out = jax.block_until_ready(
        attention_layer(x, attweight_w, attweight_b, attweight_u)
    )
    assert out.shape == (batch, 2 * hidden_size)
    assert jnp.allclose(out, expected, atol=2e-3, rtol=2e-3), (
        f"max abs diff {jnp.max(jnp.abs(out - expected))}"
    )

    # 2) Padded-batch path (B not a multiple of the block size).
    out2 = jax.block_until_ready(
        attention_layer(x[:5], attweight_w, attweight_b, attweight_u)
    )
    assert out2.shape == (5, 2 * hidden_size)
    assert jnp.allclose(out2, expected[:5], atol=2e-3, rtol=2e-3), (
        f"max abs diff (padded) {jnp.max(jnp.abs(out2 - expected[:5]))}"
    )

    # 3) Multi-block grid path (4 grid steps, exercises the "parallel" axis).
    out3 = jax.block_until_ready(
        attention_layer(x, attweight_w, attweight_b, attweight_u, block_b=8)
    )
    assert jnp.allclose(out3, expected, atol=2e-3, rtol=2e-3), (
        f"max abs diff (multi-block) {jnp.max(jnp.abs(out3 - expected))}"
    )

    print("KERNEL_OK")
</pallas_src>

<mosaic_0001>
module attributes {stable_mosaic.version = 11 : i64} {
  func.func @attention_kernel(%arg0: i32, %arg1: memref<32x8x128xf32, #tpu.memory_space<vmem>>, %arg2: memref<128x128xf32, #tpu.memory_space<vmem>>, %arg3: memref<1x128xf32, #tpu.memory_space<vmem>>, %arg4: memref<1x128xf32, #tpu.memory_space<vmem>>, %arg5: memref<32x128xf32, #tpu.memory_space<vmem>>) attributes {dimension_semantics = [#tpu.dimension_semantics<parallel>], iteration_bounds = array<i64: 1>, scalar_prefetch = 0 : i64, scratch_operands = 0 : i64, tpu.core_type = #tpu.core_type<tc>, window_params = [{transform_indices = @transform_0, window_bounds = array<i64: 32, 8, 128>}, {pipeline_mode = #tpu.pipeline_mode<synchronous>, transform_indices = @transform_1, window_bounds = array<i64: 128, 128>}, {pipeline_mode = #tpu.pipeline_mode<synchronous>, transform_indices = @transform_2, window_bounds = array<i64: 1, 128>}, {pipeline_mode = #tpu.pipeline_mode<synchronous>, transform_indices = @transform_3, window_bounds = array<i64: 1, 128>}, {transform_indices = @transform_4, window_bounds = array<i64: 32, 128>}]} {
    %c0 = arith.constant 0 : index
    %c0_0 = arith.constant 0 : index
    %c0_1 = arith.constant 0 : index
    %0 = vector.load %arg1[%c0, %c0_0, %c0_1] : memref<32x8x128xf32, #tpu.memory_space<vmem>>, vector<32x8x128xf32>
    %1 = vector.shape_cast %0 : vector<32x8x128xf32> to vector<256x128xf32>
    %c0_2 = arith.constant 0 : index
    %c0_3 = arith.constant 0 : index
    %2 = vector.load %arg2[%c0_2, %c0_3] : memref<128x128xf32, #tpu.memory_space<vmem>>, vector<128x128xf32>
    %cst = arith.constant dense<0.000000e+00> : vector<256x128xf32>
    %3 = tpu.matmul %1, %2, %cst {dimension_numbers = #tpu.dot_dimension_numbers<[1], [0], [0], [1], [0, 0, 1, 1], [], []>, precision = #tpu.contract_precision<fp32>} : vector<256x128xf32>, vector<128x128xf32>, vector<256x128xf32> -> vector<256x128xf32>
    %c0_4 = arith.constant 0 : index
    %c0_5 = arith.constant 0 : index
    %4 = vector.load %arg3[%c0_4, %c0_5] : memref<1x128xf32, #tpu.memory_space<vmem>>, vector<1x128xf32>
    %5 = vector.broadcast %4 : vector<1x128xf32> to vector<256x128xf32>
    %6 = arith.addf %3, %5 : vector<256x128xf32>
    %7 = math.tanh %6 : vector<256x128xf32>
    %8 = vector.shape_cast %7 : vector<256x128xf32> to vector<32x8x128xf32>
    %c0_6 = arith.constant 0 : index
    %c0_7 = arith.constant 0 : index
    %9 = vector.load %arg4[%c0_6, %c0_7] : memref<1x128xf32, #tpu.memory_space<vmem>>, vector<1x128xf32>
    %10 = vector.shape_cast %9 : vector<1x128xf32> to vector<1x1x128xf32>
    %11 = vector.broadcast %10 : vector<1x1x128xf32> to vector<32x8x128xf32>
    %12 = arith.mulf %8, %11 : vector<32x8x128xf32>
    %cst_8 = arith.constant dense<0.000000e+00> : vector<32x8xf32>
    %13 = vector.multi_reduction <add>, %12, %cst_8 [2] : vector<32x8x128xf32> to vector<32x8xf32>
    %cst_9 = arith.constant dense<0xFF800000> : vector<32xf32>
    %14 = vector.multi_reduction <maximumf>, %13, %cst_9 [1] : vector<32x8xf32> to vector<32xf32>
    %15 = vector.shape_cast %14 : vector<32xf32> to vector<32x1xf32>
    %16 = vector.broadcast %15 : vector<32x1xf32> to vector<32x8xf32>
    %17 = arith.subf %13, %16 : vector<32x8xf32>
    %18 = math.exp %17 : vector<32x8xf32>
    %cst_10 = arith.constant dense<0.000000e+00> : vector<32xf32>
    %19 = vector.multi_reduction <add>, %18, %cst_10 [1] : vector<32x8xf32> to vector<32xf32>
    %20 = vector.shape_cast %19 : vector<32xf32> to vector<32x1xf32>
    %21 = vector.broadcast %20 : vector<32x1xf32> to vector<32x8xf32>
    %22 = arith.divf %18, %21 : vector<32x8xf32>
    %23 = vector.shape_cast %22 : vector<32x8xf32> to vector<32x8x1xf32>
    %24 = vector.broadcast %23 : vector<32x8x1xf32> to vector<32x8x128xf32>
    %25 = arith.mulf %0, %24 : vector<32x8x128xf32>
    %cst_11 = arith.constant dense<0.000000e+00> : vector<32x128xf32>
    %26 = vector.multi_reduction <add>, %25, %cst_11 [1] : vector<32x8x128xf32> to vector<32x128xf32>
    %c0_12 = arith.constant 0 : index
    %c0_13 = arith.constant 0 : index
    %27 = vector.load %arg5[%c0_12, %c0_13] : memref<32x128xf32, #tpu.memory_space<vmem>>, vector<32x128xf32>
    tpu.vector_store %arg5[%c0_12, %c0_13], %26 {strides = array<i32>} : memref<32x128xf32, #tpu.memory_space<vmem>>, vector<32x128xf32>,
    return
  }
  func.func @transform_0(%arg0: i32) -> (i32, i32, i32) {
    %c0_i32 = arith.constant 0 : i32
    %c0_i32_0 = arith.constant 0 : i32
    %c0_i32_1 = arith.constant 0 : i32
    return %arg0, %c0_i32, %c0_i32_0 : i32, i32, i32
  }
  func.func @transform_1(%arg0: i32) -> (i32, i32) {
    %c0_i32 = arith.constant 0 : i32
    %c0_i32_0 = arith.constant 0 : i32
    %c0_i32_1 = arith.constant 0 : i32
    return %c0_i32, %c0_i32_0 : i32, i32
  }
  func.func @transform_2(%arg0: i32) -> (i32, i32) {
    %c0_i32 = arith.constant 0 : i32
    %c0_i32_0 = arith.constant 0 : i32
    %c0_i32_1 = arith.constant 0 : i32
    return %c0_i32, %c0_i32_0 : i32, i32
  }
  func.func @transform_3(%arg0: i32) -> (i32, i32) {
    %c0_i32 = arith.constant 0 : i32
    %c0_i32_0 = arith.constant 0 : i32
    %c0_i32_1 = arith.constant 0 : i32
    return %c0_i32, %c0_i32_0 : i32, i32
  }
  func.func @transform_4(%arg0: i32) -> (i32, i32) {
    %c0_i32 = arith.constant 0 : i32
    %c0_i32_0 = arith.constant 0 : i32
    return %arg0, %c0_i32 : i32, i32
  }
}

</mosaic_0001>

<bundles_post_ra>
// kernel: tpu_custom_call.1
= control target key start
LH: loop header
LB: loop body
LE: loop exit
PB: predicated region body
PF: predicated region fallthrough
CT: control target
= control target key end

     0   :  { %9 = vsyncpa [#allocation3], 0  ;;  %s6610_s0 = inlined_call_operand.hbm [shape: f32[32,8,128], index: 0, kind: input, shape index: {}]   ;;  %s6611_s1 = inlined_call_operand.hbm [shape: f32[128,128], index: 1, kind: input, shape index: {}]   ;;  %s6612_s2 = inlined_call_operand.vmem [shape: f32[1,128], index: 2, kind: input, shape index: {}]   ;;  %s6613_s3 = inlined_call_operand.vmem [shape: f32[1,128], index: 3, kind: input, shape index: {}]   ;;  %s6614_s4 = inlined_call_operand.hbm [shape: f32[32,128], index: 4, kind: output, shape index: {}]  }
   0x1   :  { %10 = vsyncpa [#allocation6], 0 }
   0x2   :  { %11 = vsyncpa [#allocation4], 0  ;;  %s5140_s15 = smov [#allocation2]   ;;  %s5068_s19 = scalar_lea.hbm %s6610_s0, 4096 }
   0x3   :  { %s17_s16 = sshll.u32 %s5140_s15, 4  ;;  %p5069_p0 = scmp.ne.s32.totalorder %s6610_s0, %s5068_s19  ;;  %s18_s16 = int_to_ptr.vmem [resolvable:$true] %s17_s16 }
   0x4   :  { %p5072_p1 = scmp.lt.u32.totalorder %s5068_s19, %s6610_s0 }
   0x6   :  { %p5074_p2 = pnand %p5072_p1, %p5069_p0 }
   0x8   :  { %5077 = shalt.err (!%p5074_p2)
}
   0x9   :  { %s5078_s24 = scalar_lea.vmem %s18_s16, 4096  ;;  %p5083_p4 = scmp.lt.s32.totalorder %s18_s16, %s18_s16 }
   0xa   :  { %p5079_p3 = scmp.ne.s32.totalorder %s18_s16, %s5078_s24  ;;  %p5084_p5 = scmp.lt.s32.totalorder %s5078_s24, %s5078_s24 }
   0xc   :  { %p5085_p6 = por %p5084_p5, %p5083_p4 }
   0xe   :  { %p5086_p7 = pnand %p5085_p6, %p5079_p3 }
  0x10   :  { %5089 = shalt.err (!%p5086_p7)
}
  0x11   :  { %s5141_s25 = smov 128   ;;  %s5142_s26 = smov 8  }
  0x12   :  { %23 = dma.hbm_to_vmem [thread:$0]  %s6610_s0, 4096, %s18_s16, [#allocation3], %s5141_s25, %s5141_s25, %s5142_s26  }
  0x13   :  { %s5143_s29 = smov [#allocation5]   ;;  %s5090_s7 = scalar_lea.hbm %s6611_s1, 2048 }
  0x14   :  { %s29_s30 = sshll.u32 %s5143_s29, 4  ;;  %p5091_p8 = scmp.ne.s32.totalorder %s6611_s1, %s5090_s7  ;;  %s30_s30 = int_to_ptr.vmem [resolvable:$true] %s29_s30 }
  0x15   :  { %p5094_p9 = scmp.lt.u32.totalorder %s5090_s7, %s6611_s1 }
  0x17   :  { %p5096_p10 = pnand %p5094_p9, %p5091_p8 }
  0x19   :  { %5099 = shalt.err (!%p5096_p10)
}
  0x1a   :  { %s5100_s12 = scalar_lea.vmem %s30_s30, 2048  ;;  %p5105_p12 = scmp.lt.s32.totalorder %s30_s30, %s30_s30 }
  0x1b   :  { %p5101_p11 = scmp.ne.s32.totalorder %s30_s30, %s5100_s12  ;;  %p5106_p13 = scmp.lt.s32.totalorder %s5100_s12, %s5100_s12 }
  0x1d   :  { %p5107_p0 = por %p5106_p13, %p5105_p12 }
  0x1f   :  { %p5108_p1 = pnand %p5107_p0, %p5101_p11 }
  0x21   :  { %5111 = shalt.err (!%p5108_p1)
}
  0x22   :  { %35 = dma.hbm_to_vmem [thread:$0]  %s6611_s1, 2048, %s30_s30, [#allocation6], %s5141_s25, %s5141_s25, %s5142_s26  }
  0x23   :  { %5134 = dma.done.wait [#allocation3], 4096  }
  0x24   :  { %5135 = vsyncadd [#allocation3], 4294963200 }
  0x25   :  { %5136 = dma.done.wait [#allocation6], 2048  }
  0x26   :  { %5137 = vsyncadd [#allocation6], 4294965248  ;;  %v78_v0 = vld [vmem:[#allocation5] sm:$0xff]  ;;  %v79_v1 = vld [vmem:[#allocation5 + $0x8] sm:$0xff]  ;;  %vm2372_vm0 = vcmask 1041409   ;;  %vm2374_vm1 = vcmask 1042434  }
  0x27   :  { %v5201_v2 = vld [vmem:[#allocation5 + $0x10] sm:$0xff]  ;;  %v102_v3 = vand.u32 4294901760, %v78_v0  ;;  %v105_v4 = vand.u32 4294901760, %v79_v1  ;;  %v5203_v5 = vld [vmem:[#allocation5 + $0x18] sm:$0xff]  ;;  %v5206_v7 = vld [vmem:[#allocation5 + $0x20] sm:$0xff]  ;;  %vm2376_vm2 = vcmask 1043459  }
  0x28   :  { %v108_v6 = vand.u32 4294901760, %v5201_v2  ;;  %v5208_v8 = vld [vmem:[#allocation5 + $0x28] sm:$0xff]  ;;  %v111_v9 = vand.u32 4294901760, %v5203_v5  ;;  %v114_v11 = vand.u32 4294901760, %v5206_v7  ;;  %v5221_v14 = vld [vmem:[#allocation5 + $0x30] sm:$0xff]  ;;  %v5223_v15 = vld [vmem:[#allocation5 + $0x38] sm:$0xff] }
  0x29   :  { %v5211_v10 = vpack.c.bf16 %v105_v4, %v102_v3  ;;  %v117_v12 = vand.u32 4294901760, %v5208_v8  ;;  %v46_v16 = vld [vmem:[#allocation2] sm:$0xff]  ;;  %v120_v19 = vand.u32 4294901760, %v5221_v14  ;;  %v123_v20 = vand.u32 4294901760, %v5223_v15  ;;  %v5243_v22 = vld [vmem:[#allocation5 + $0x48] sm:$0xff]  ;;  %v5261_v29 = vld [vmem:[#allocation5 + $0x50] sm:$0xff] }
  0x2a   :  { %v5219_v13 = vpack.c.bf16 %v111_v9, %v108_v6  ;;  %v5229_v17 = vand.u32 4294901760, %v46_v16  ;;  %v5241_v21 = vld [vmem:[#allocation5 + $0x40] sm:$0xff]  ;;  %v47_v25 = vld [vmem:[#allocation2 + $0x8] sm:$0xff]  ;;  %v6622_v28 = vand.u32 4294901760, %v5243_v22  ;;  %v5263_v30 = vld [vmem:[#allocation5 + $0x58] sm:$0xff]  ;;  %v6620_v35 = vand.u32 4294901760, %v5261_v29 }
  0x2b   :  { %4453 = vmatprep.subr.bf16.mxu1 %v5211_v10  ;;  %4549 = vmatprep.subr.bf16.mxu0 %v5211_v10  ;;  %v5237_v18 = vpack.c.bf16 %v117_v12, %v114_v11  ;;  %v5257_v26 = vpack.c.bf16 %v123_v20, %v120_v19  ;;  %v6623_v27 = vand.u32 4294901760, %v5241_v21  ;;  %v48_v32 = vld [vmem:[#allocation2 + $0x10] sm:$0xff]  ;;  %v5266_v33 = vand.u32 4294901760, %v47_v25  ;;  %v49_v34 = vld [vmem:[#allocation2 + $0x18] sm:$0xff]  ;;  %v5272_v37 = vld [vmem:[#allocation5 + $0x60] sm:$0xff] }
  0x2c   :  { %4455 = vmatpush3.bf16.msra.mxu1 %v5211_v10  ;;  %4551 = vmatpush3.bf16.msra.mxu0 %v5211_v10  ;;  %v5246_v23 = vsub.f32 %v46_v16, %v5229_v17  ;;  %v6619_v36 = vand.u32 4294901760, %v5263_v30  ;;  %v5274_v39 = vsub.f32 %v78_v0, %v102_v3  ;;  %v5284_v41 = vld [vmem:[#allocation5 + $0x68] sm:$0xff]  ;;  %v5286_v42 = vsub.f32 %v79_v1, %v105_v4  ;;  %v50_v44 = vld [vmem:[#allocation2 + $0x20] sm:$0xff]  ;;  %v5293_v47 = vld [vmem:[#allocation5 + $0x70] sm:$0xff] }
  0x2d   :  { %4457 = vmatprep.subr.bf16.mxu1 %v5219_v13  ;;  %4553 = vmatprep.subr.bf16.mxu0 %v5219_v13  ;;  %6680 = vst [vmem:[#allocation12_spill] sm:$0xff] %v5257_v26  ;;  %v5282_v40 = vpack.c.bf16 %v6622_v28, %v6623_v27  ;;  %v5288_v43 = vand.u32 4294901760, %v48_v32  ;;  %v5290_v45 = vand.u32 4294901760, %v49_v34  ;;  %v6618_v46 = vand.u32 4294901760, %v5272_v37  ;;  %v5295_v48 = vld [vmem:[#allocation5 + $0x78] sm:$0xff]  ;;  %v51_v56 = vld [vmem:[#allocation2 + $0x28] sm:$0xff] }
  0x2e   :  { %6679 = vst [vmem:[#allocation11_spill] sm:$0xff] %v5246_v23  ;;  %v184_v24 = vand.u32 4294901760, %v5246_v23  ;;  %v5298_v49 = vsub.f32 %v47_v25, %v5266_v33  ;;  %v5306_v50 = vpack.c.bf16 %v6619_v36, %v6620_v35  ;;  %v6617_v51 = vand.u32 4294901760, %v5284_v41  ;;  %v52_v3 = vld [vmem:[#allocation2 + $0x30] sm:$0xff]  ;;  %v53_v4 = vld [vmem:[#allocation2 + $0x38] sm:$0xff] }
  0x2f   :  { %6681 = vst [vmem:[#allocation13_spill] sm:$0xff] %v5282_v40  ;;  %v505_v52 = vand.u32 4294901760, %v5274_v39  ;;  %v5310_v53 = vand.u32 4294901760, %v50_v44  ;;  %v512_v54 = vand.u32 4294901760, %v5286_v42  ;;  %v5316_v55 = vsub.f32 %v48_v32, %v5288_v43 }
  0x30   :  { %4459 = vmatpush3.bf16.msra.mxu1 %v5219_v13  ;;  %4555 = vmatpush3.bf16.msra.mxu0 %v5219_v13  ;;  %v185_v31 = vsub.f32 %v5246_v23, %v184_v24  ;;  %6682 = vst [vmem:[#allocation14_spill] sm:$0xff] %v5298_v49  ;;  %6683 = vst [vmem:[#allocation15_spill] sm:$0xff] %v5306_v50  ;;  %v5321_v57 = vsub.f32 %v5201_v2, %v108_v6  ;;  %v6616_v59 = vand.u32 4294901760, %v5293_v47  ;;  %vm2378_vm3 = vcmask 1044484  }
  0x31   :  { %4461 = vmatprep.subr.bf16.mxu1 %v5237_v18  ;;  %4557 = vmatprep.subr.bf16.mxu0 %v5237_v18  ;;  %6684 = vst [vmem:[#allocation16_spill] sm:$0xff] %v5316_v55  ;;  %v5326_v58 = vsub.f32 %v5203_v5, %v111_v9  ;;  %v6615_v60 = vand.u32 4294901760, %v5295_v48  ;;  %v5331_v61 = vsub.f32 %v49_v34, %v5290_v45  ;;  %v6625_v62 = vand.u32 4294901760, %v5298_v49 }
  0x32   :  { %4244 = vmatprep.mubr.f32.mxu0 %v184_v24  ;;  %v186_v38 = vand.u32 4294901760, %v185_v31  ;;  %v5340_v63 = vpack.c.bf16 %v6617_v51, %v6618_v46  ;;  %v506_v0 = vsub.f32 %v5274_v39, %v505_v52  ;;  %v5344_v1 = vsub.f32 %v50_v44, %v5310_v53  ;;  %v54_v24 = vld [vmem:[#allocation2 + $0x40] sm:$0xff]  ;;  %v55_v51 = vld [vmem:[#allocation2 + $0x48] sm:$0xff] }
  0x33   :  { %6685 = vst [vmem:[#allocation17_spill] sm:$0xff] %v5331_v61  ;;  %v5346_v2 = vand.u32 4294901760, %v51_v56  ;;  %v513_v5 = vsub.f32 %v5286_v42, %v512_v54  ;;  %v6621_v6 = vand.u32 4294901760, %v5316_v55  ;;  %v6627_v9 = vand.u32 4294901760, %v5321_v57 }
  0x34   :  { %4463 = vmatpush3.bf16.msra.mxu1 %v5237_v18  ;;  %4559 = vmatpush3.bf16.msra.mxu0 %v5237_v18  ;;  %6686 = vst [vmem:[#allocation18_spill] sm:$0xff] %v5340_v63  ;;  %6687 = vst [vmem:[#allocation19_spill] sm:$0xff] %v5344_v1  ;;  %v6626_v16 = vand.u32 4294901760, %v5326_v58  ;;  %v5358_v25 = vpack.c.bf16 %v6615_v60, %v6616_v59  ;;  %v6624_v31 = vand.u32 4294901760, %v5331_v61  ;;  %v5378_v60 = vand.u32 4294901760, %v52_v3 }
  0x35   :  { %4465 = vmatprep.subr.bf16.mxu1 %v5257_v26  ;;  %4561 = vmatprep.subr.bf16.mxu0 %v5257_v26  ;;  %6688 = vst [vmem:[#allocation20_spill] sm:$0xff] %v5346_v2  ;;  %v5364_v32 = vsub.f32 %v5206_v7, %v114_v11  ;;  %v5369_v34 = vsub.f32 %v5208_v8, %v117_v12  ;;  %v5380_v59 = vand.u32 4294901760, %v53_v4  ;;  %v507_v7 = vand.u32 4294901760, %v506_v0 }
  0x36   :  { %4004 = vmatprep.mubr.f32.mxu1 %v186_v38  ;;  %6689 = vst [vmem:[#allocation21_spill] sm:$0xff] %v5358_v25  ;;  %v5374_v38 = vsub.f32 %v5298_v49, %v6625_v62  ;;  %v5376_v44 = vpack.c.bf16 %v512_v54, %v505_v52  ;;  %6690 = vst [vmem:[#allocation22_spill] sm:$0xff] %v5378_v60  ;;  %v6629_v11 = vand.u32 4294901760, %v5344_v1  ;;  %v5388_v12 = vand.u32 4294901760, %v54_v24 }
  0x37   :  { %6691 = vst [vmem:[#allocation23_spill] sm:$0xff] %v5380_v59  ;;  %v5386_v8 = vsub.f32 %v51_v56, %v5346_v2  ;;  %v514_v52 = vand.u32 4294901760, %v513_v5  ;;  %v205_v54 = vsub.f32 %v5316_v55, %v6621_v6  ;;  %v520_v0 = vsub.f32 %v5321_v57, %v6627_v9  ;;  %v56_v9 = vld [vmem:[#allocation2 + $0x50] sm:$0xff] }
  0x38   :  { %4467 = vmatpush3.bf16.msra.mxu1 %v5257_v26  ;;  %4563 = vmatpush3.bf16.msra.mxu0 %v5257_v26  ;;  %6693 = vst [vmem:[#allocation25_spill] sm:$0xff] %v5388_v12  ;;  %v527_v56 = vsub.f32 %v5326_v58, %v6626_v16  ;;  %v5404_v46 = vsub.f32 %v5331_v61, %v6624_v31  ;;  %v533_v36 = vand.u32 4294901760, %v5364_v32  ;;  %v540_v5 = vand.u32 4294901760, %v5369_v34 }
  0x39   :  { %4469 = vmatprep.subr.bf16.mxu1 %v5282_v40  ;;  %4565 = vmatprep.subr.bf16.mxu0 %v5282_v40  ;;  %6692 = vst [vmem:[#allocation24_spill] sm:$0xff] %v5386_v8  ;;  %v5411_v35 = vsub.f32 %v5221_v14, %v120_v19  ;;  %v5414_v6 = vsub.f32 %v52_v3, %v5378_v60  ;;  %v5419_v27 = vand.u32 4294901760, %v55_v51  ;;  %v196_v14 = vand.u32 4294901760, %v5374_v38 }
  0x3a   :  { %v5417_v28 = vsub.f32 %v53_v4, %v5380_v59  ;;  %v5424_v31 = vsub.f32 %v5223_v15, %v123_v20  ;;  %v5432_v19 = vsub.f32 %v5344_v1, %v6629_v11  ;;  %v5436_v4 = vsub.f32 %v54_v24, %v5388_v12  ;;  %v57_v11 = vld [vmem:[#allocation2 + $0x58] sm:$0xff] }
  0x3b   :  { %6694 = vst [vmem:[#allocation26_spill] sm:$0xff] %v5414_v6  ;;  %6696 = vst [vmem:[#allocation28_spill] sm:$0xff] %v5419_v27  ;;  %v4484_v15 = vpack.c.bf16 %v514_v52, %v507_v7  ;;  %v206_v20 = vand.u32 4294901760, %v205_v54  ;;  %v521_v62 = vand.u32 4294901760, %v520_v0  ;;  %v528_v16 = vand.u32 4294901760, %v527_v56 }
  0x3c   :  { %4471 = vmatpush3.bf16.msra.mxu1 %v5282_v40  ;;  %4567 = vmatpush3.bf16.msra.mxu0 %v5282_v40  ;;  %6695 = vst [vmem:[#allocation27_spill] sm:$0xff] %v5417_v28  ;;  %6697 = vst [vmem:[#allocation29_spill] sm:$0xff] %v5436_v4  ;;  %v534_v38 = vsub.f32 %v5364_v32, %v533_v36  ;;  %v541_v23 = vsub.f32 %v5369_v34, %v540_v5  ;;  %v226_v54 = vand.u32 4294901760, %v5432_v19  ;;  %vm2380_vm4 = vcmask 1045509  }
  0x3d   :  { %4473 = vmatprep.subr.bf16.mxu1 %v5306_v50  ;;  %4569 = vmatprep.subr.bf16.mxu0 %v5306_v50  ;;  %v5448_v52 = vsub.f32 %v55_v51, %v5419_v27  ;;  %v6699_v0 = vand.u32 4294901760, %v5386_v8  ;;  %v5459_v24 = vand.u32 4294901760, %v56_v9  ;;  %v4488_v51 = vpack.c.bf16 %v528_v16, %v521_v62  ;;  %v59_v27 = vld [vmem:[#allocation2 + $0x68] sm:$0xff] }
  0x3e   :  { %v6701_v7 = vand.u32 4294901760, %v5321_v57  ;;  %v6702_v40 = vand.u32 4294901760, %v5326_v58  ;;  %v542_v12 = vand.u32 4294901760, %v541_v23  ;;  %v6704_v26 = vand.u32 4294901760, %v5424_v31 }
  0x3f   :  { %6698 = vst [vmem:[#allocation30_spill] sm:$0xff] %v5448_v52  ;;  %v5456_v56 = vsub.f32 %v5386_v8, %v6699_v0  ;;  %6700 = vst [vmem:[#allocation31_spill] sm:$0xff] %v5459_v24  ;;  %v535_v0 = vand.u32 4294901760, %v534_v38  ;;  %v6705_v16 = vand.u32 4294901760, %v5298_v49  ;;  %v6707_v60 = vand.u32 4294901760, %v5417_v28 }
  0x40   :  { %4475 = vmatpush3.bf16.msra.mxu1 %v5306_v50  ;;  %4571 = vmatpush3.bf16.msra.mxu0 %v5306_v50  ;;  %v216_v50 = vand.u32 4294901760, %v5404_v46  ;;  %v4584_v3 = vpack.c.bf16 %v6702_v40, %v6701_v7  ;;  %v6703_v46 = vand.u32 4294901760, %v5411_v35  ;;  %v555_v62 = vsub.f32 %v5424_v31, %v6704_v26 }
  0x41   :  { %4477 = vmatprep.subr.bf16.mxu1 %v5340_v63  ;;  %4573 = vmatprep.subr.bf16.mxu0 %v5340_v63  ;;  %v6706_v40 = vand.u32 4294901760, %v5414_v6  ;;  %v5484_v23 = vsub.f32 %v5417_v28, %v6707_v60  ;;  %v6709_v26 = vand.u32 4294901760, %v5436_v4  ;;  %v60_v60 = vld [vmem:[#allocation2 + $0x70] sm:$0xff]  ;;  %v6712_v38 = vand.u32 4294901760, %v5243_v22 }
  0x42   :  { %v548_v59 = vsub.f32 %v5411_v35, %v6703_v46  ;;  %v6708_v46 = vand.u32 4294901760, %v5241_v21  ;;  %vm2384_vm5 = vcmask 1047559   ;;  %vm2382_vm6 = vcmask 1046534  }
  0x43   :  { %v245_v7 = vsub.f32 %v5414_v6, %v6706_v40  ;;  %v5500_v40 = vand.u32 4294901760, %v59_v27  ;;  %v5505_v49 = vsub.f32 %v5243_v22, %v6712_v38  ;;  %v556_v22 = vand.u32 4294901760, %v555_v62 }
  0x44   :  { %4479 = vmatpush3.bf16.msra.mxu1 %v5340_v63  ;;  %4575 = vmatpush3.bf16.msra.mxu0 %v5340_v63  ;;  %v58_v63 = vld [vmem:[#allocation2 + $0x60] sm:$0xff]  ;;  %v5490_v2 = vsub.f32 %v5241_v21, %v6708_v46  ;;  %v6713_v21 = vand.u32 4294901760, %v5316_v55  ;;  %vm2411_vm7 = vcmask 64512  }
  0x45   :  { %4481 = vmatprep.subr.bf16.mxu1 %v5358_v25  ;;  %4577 = vmatprep.subr.bf16.mxu0 %v5358_v25  ;;  %v5468_v19 = vand.u32 4294901760, %v58_v63  ;;  %6711 = vst [vmem:[#allocation33_spill] sm:$0xff] %v5500_v40  ;;  %v568_v38 = vand.u32 4294901760, %v5505_v49 }
  0x46   :  { %v561_v46 = vand.u32 4294901760, %v5490_v2 }
  0x47   :  { %v569_v62 = vsub.f32 %v5505_v49, %v568_v38 }
  0x48   :  { %4483 = vmatpush3.bf16.msra.mxu1 %v5358_v25  ;;  %4579 = vmatpush3.bf16.msra.mxu0 %v5358_v25  ;;  %v5466_v25 = vand.u32 4294901760, %v57_v11 }
  0x49   :  { %4485 = vmatprep.subr.bf16.mxu1 %v4484_v15  ;;  %4581 = vmatprep.subr.bf16.mxu0 %v5376_v44 }
  0x4b   :  { %4005 = vmatmul.mubr.f32.vlgmr.msra.gmra.mrb[0].mxu1 %v196_v14  ;;  %4245 = vmatmul.mubr.f32.vlgmr.msra.gmra.mrb[0].mxu0 %v6705_v16  ;;  %v5495_v14 = vsub.f32 %v5436_v4, %v6709_v26  ;;  %v5498_v16 = vsub.f32 %v56_v9, %v5459_v24  ;;  %v5514_v9 = vsub.f32 %v58_v63, %v5468_v19  ;;  %v549_v24 = vand.u32 4294901760, %v548_v59 }
  0x4c   :  { %4487 = vmatpush3.bf16.msra.mxu1 %v4484_v15  ;;  %4007 = vmatprep.mubr.f32.mxu1 %v206_v20  ;;  %v4588_v15 = vpack.c.bf16 %v540_v5, %v533_v36  ;;  %v5511_v20 = vsub.f32 %v57_v11, %v5466_v25  ;;  %v4492_v26 = vpack.c.bf16 %v542_v12, %v535_v0  ;;  %v236_v36 = vand.u32 4294901760, %v5456_v56  ;;  %v61_v56 = vld [vmem:[#allocation2 + $0x78] sm:$0xff] }
  0x4d   :  { %6710 = vst [vmem:[#allocation32_spill] sm:$0xff] %v5498_v16  ;;  %4247 = vmatprep.mubr.f32.mxu0 %v6713_v21  ;;  %4583 = vmatpush3.bf16.msra.mxu0 %v5376_v44  ;;  %6715 = vst [vmem:[#allocation35_spill] sm:$0xff] %v5514_v9  ;;  %v6716_v21 = vand.u32 4294901760, %v5331_v61  ;;  %v246_v44 = vand.u32 4294901760, %v245_v7  ;;  %v5521_v11 = vand.u32 4294901760, %v60_v60  ;;  %v562_v63 = vsub.f32 %v5490_v2, %v561_v46 }
  0x4e   :  { %6714 = vst [vmem:[#allocation34_spill] sm:$0xff] %v5511_v20  ;;  %4489 = vmatprep.subr.bf16.mxu1 %v4488_v51  ;;  %4585 = vmatprep.subr.bf16.mxu0 %v4584_v3  ;;  %v6718_v5 = vand.u32 4294901760, %v5344_v1  ;;  %v6719_v59 = vand.u32 4294901760, %v5448_v52  ;;  %v5533_v0 = vsub.f32 %v59_v27, %v5500_v40  ;;  %v266_v7 = vand.u32 4294901760, %v5495_v14  ;;  %v63_v1 = vld [vmem:[#allocation2 + $0x88] sm:$0xff] }
  0x4f   :  { %4008 = vmatmul.mubr.f32.gmra.mrb[2].mxu1 %v216_v50  ;;  %4248 = vmatmul.mubr.f32.gmra.mrb[2].mxu0 %v6716_v21  ;;  %6717 = vst [vmem:[#allocation36_spill] sm:$0xff] %v5521_v11  ;;  %v4496_v50 = vpack.c.bf16 %v556_v22, %v549_v24  ;;  %v6721_v27 = vand.u32 4294901760, %v5411_v35  ;;  %v6722_v61 = vand.u32 4294901760, %v5424_v31  ;;  %v5547_v14 = vsub.f32 %v60_v60, %v5521_v11  ;;  %v64_v21 = vld [vmem:[#allocation2 + $0x90] sm:$0xff] }
  0x50   :  { %4010 = vmatprep.mubr.f32.mxu1 %v226_v54  ;;  %4250 = vmatprep.mubr.f32.mxu0 %v6718_v5  ;;  %v5529_v12 = vsub.f32 %v5448_v52, %v6719_v59  ;;  %6720 = vst [vmem:[#allocation37_spill] sm:$0xff] %v5533_v0  ;;  %v256_v54 = vand.u32 4294901760, %v5484_v23  ;;  %v62_v59 = vld [vmem:[#allocation2 + $0x80] sm:$0xff]  ;;  %v6723_v23 = vand.u32 4294901760, %v5386_v8  ;;  %v5549_v5 = vand.u32 4294901760, %v61_v56 }
  0x51   :  { %4491 = vmatpush3.bf16.msra.mxu1 %v4488_v51  ;;  %4587 = vmatpush3.bf16.msra.mxu0 %v4584_v3  ;;  %v4592_v55 = vpack.c.bf16 %v6722_v61, %v6721_v27  ;;  %v563_v51 = vand.u32 4294901760, %v562_v63  ;;  %v570_v3 = vand.u32 4294901760, %v569_v62  ;;  %6724 = vst [vmem:[#allocation38_spill] sm:$0xff] %v5547_v14  ;;  %v6725_v40 = vand.u32 4294901760, %v5261_v29 }
  0x52   :  { %4493 = vmatprep.subr.bf16.mxu1 %v4492_v26  ;;  %4589 = vmatprep.subr.bf16.mxu0 %v4588_v15  ;;  %v6726_v22 = vand.u32 4294901760, %v5263_v30  ;;  %v6728_v60 = vand.u32 4294901760, %v5498_v16  ;;  %v5567_v27 = vand.u32 4294901760, %v62_v59  ;;  %v5588_v8 = vsub.f32 %v61_v56, %v5549_v5 }
  0x53   :  { %4011 = vmatmul.mubr.f32.gmra.mrb[4].mxu1 %v236_v36  ;;  %4251 = vmatmul.mubr.f32.gmra.mrb[4].mxu0 %v6723_v23  ;;  %v5554_v24 = vsub.f32 %v5261_v29, %v6725_v40  ;;  %v6727_v36 = vand.u32 4294901760, %v5414_v6  ;;  %v5569_v23 = vand.u32 4294901760, %v63_v1  ;;  %v276_v29 = vand.u32 4294901760, %v5529_v12 }
  0x54   :  { %v5559_v61 = vsub.f32 %v5263_v30, %v6726_v22  ;;  %4013 = vmatprep.mubr.f32.mxu1 %v246_v44  ;;  %v285_v63 = vsub.f32 %v5498_v16, %v6728_v60  ;;  %v6729_v30 = vand.u32 4294901760, %v5511_v20  ;;  %v4500_v62 = vpack.c.bf16 %v570_v3, %v563_v51 }
  0x55   :  { %4253 = vmatprep.mubr.f32.mxu0 %v6727_v36  ;;  %4495 = vmatpush3.bf16.msra.mxu1 %v4492_v26  ;;  %v575_v44 = vand.u32 4294901760, %v5554_v24  ;;  %v6730_v36 = vand.u32 4294901760, %v5514_v9  ;;  %v4596_v6 = vpack.c.bf16 %v568_v38, %v561_v46  ;;  %v5582_v12 = vand.u32 4294901760, %v64_v21 }
  0x56   :  { %4591 = vmatpush3.bf16.msra.mxu0 %v4588_v15  ;;  %v295_v40 = vsub.f32 %v5511_v20, %v6729_v30  ;;  %v582_v22 = vand.u32 4294901760, %v5559_v61  ;;  %4497 = vmatprep.subr.bf16.mxu1 %v4496_v50  ;;  %v65_v15 = vld [vmem:[#allocation2 + $0x98] sm:$0xff]  ;;  %v6731_v26 = vand.u32 4294901760, %v5417_v28  ;;  %v6732_v51 = vand.u32 4294901760, %v5436_v4 }
  0x57   :  { %v5580_v60 = vsub.f32 %v5514_v9, %v6730_v36  ;;  %4593 = vmatprep.subr.bf16.mxu0 %v4592_v55  ;;  %4014 = vmatmul.mubr.f32.gmra.mrb[6].mxu1 %v256_v54  ;;  %v576_v11 = vsub.f32 %v5554_v24, %v575_v44  ;;  %v286_v46 = vand.u32 4294901760, %v285_v63  ;;  %v6733_v38 = vand.u32 4294901760, %v5533_v0 }
  0x58   :  { %4254 = vmatmul.mubr.f32.gmra.mrb[6].mxu0 %v6731_v26  ;;  %v583_v36 = vsub.f32 %v5559_v61, %v582_v22  ;;  %4016 = vmatprep.mubr.f32.mxu1 %v266_v7  ;;  %v5600_v3 = vsub.f32 %v62_v59, %v5567_v27  ;;  %v5603_v56 = vsub.f32 %v63_v1, %v5569_v23  ;;  %v5605_v26 = vand.u32 4294901760, %v65_v15  ;;  %v66_v7 = vld [vmem:[#allocation2 + $0xa0] sm:$0xff]  ;;  %v67_v1 = vld [vmem:[#allocation2 + $0xa8] sm:$0xff] }
  0x59   :  { %4256 = vmatprep.mubr.f32.mxu0 %v6732_v51  ;;  %v5597_v54 = vsub.f32 %v5533_v0, %v6733_v38  ;;  %4499 = vmatpush3.bf16.msra.mxu1 %v4496_v50  ;;  %v577_v30 = vand.u32 4294901760, %v576_v11  ;;  %v6735_v63 = vand.u32 4294901760, %v5272_v37  ;;  %v296_v38 = vand.u32 4294901760, %v295_v40 }
  0x5a   :  { %4595 = vmatpush3.bf16.msra.mxu0 %v4592_v55  ;;  %6734 = vst [vmem:[#allocation39_spill] sm:$0xff] %v5605_v26  ;;  %v584_v4 = vand.u32 4294901760, %v583_v36  ;;  %4501 = vmatprep.subr.bf16.mxu1 %v4500_v62  ;;  %v5613_v59 = vsub.f32 %v64_v21, %v5582_v12  ;;  %v4600_v28 = vpack.c.bf16 %v582_v22, %v575_v44  ;;  %v6736_v55 = vand.u32 4294901760, %v5284_v41 }
  0x5b   :  { %v5610_v51 = vsub.f32 %v5272_v37, %v6735_v63  ;;  %4597 = vmatprep.subr.bf16.mxu0 %v4596_v6  ;;  %4017 = vmatmul.mubr.f32.gmra.mrb[8].mxu1 %v276_v29  ;;  %v6737_v11 = vand.u32 4294901760, %v5448_v52  ;;  %v6738_v37 = vand.u32 4294901760, %v5547_v14  ;;  %v6739_v44 = vand.u32 4294901760, %v5498_v16  ;;  %v69_v52 = vld [vmem:[#allocation2 + $0xb8] sm:$0xff] }
  0x5c   :  { %v5618_v50 = vsub.f32 %v5284_v41, %v6736_v55  ;;  %v4504_v63 = vpack.c.bf16 %v584_v4, %v577_v30  ;;  %4019 = vmatprep.mubr.f32.mxu1 %v286_v46  ;;  %v306_v41 = vand.u32 4294901760, %v5580_v60  ;;  %v5631_v22 = vand.u32 4294901760, %v66_v7  ;;  %v68_v55 = vld [vmem:[#allocation2 + $0xb0] sm:$0xff] }
  0x5d   :  { %4257 = vmatmul.mubr.f32.gmra.mrb[8].mxu0 %v6737_v11  ;;  %v325_v40 = vsub.f32 %v5547_v14, %v6738_v37  ;;  %v589_v21 = vand.u32 4294901760, %v5610_v51  ;;  %4503 = vmatpush3.bf16.msra.mxu1 %v4500_v62  ;;  %v5636_v4 = vsub.f32 %v65_v15, %v5605_v26  ;;  %v5638_v30 = vand.u32 4294901760, %v67_v1 }
  0x5e   :  { %4259 = vmatprep.mubr.f32.mxu0 %v6739_v44  ;;  %v596_v11 = vand.u32 4294901760, %v5618_v50  ;;  %4599 = vmatpush3.bf16.msra.mxu0 %v4596_v6  ;;  %v316_v60 = vand.u32 4294901760, %v5597_v54  ;;  %v6741_v62 = vand.u32 4294901760, %v5511_v20  ;;  %v6742_v15 = vand.u32 4294901760, %v5588_v8 }
  0x5f   :  { %6740 = vst [vmem:[#allocation40_spill] sm:$0xff] %v5638_v30  ;;  %v590_v46 = vsub.f32 %v5610_v51, %v589_v21  ;;  %4505 = vmatprep.subr.bf16.mxu1 %v4504_v63  ;;  %4601 = vmatprep.subr.bf16.mxu0 %v4600_v28  ;;  %v326_v6 = vand.u32 4294901760, %v325_v40  ;;  %v5649_v16 = vand.u32 4294901760, %v68_v55  ;;  %v6744_v44 = vand.u32 4294901760, %v5514_v9 }
  0x60   :  { %v597_v29 = vsub.f32 %v5618_v50, %v596_v11  ;;  %v4604_v36 = vpack.c.bf16 %v596_v11, %v589_v21  ;;  %4020 = vmatmul.mubr.f32.gmra.mrb[10].mxu1 %v296_v38  ;;  %v335_v37 = vsub.f32 %v5588_v8, %v6742_v15  ;;  %v6745_v26 = vand.u32 4294901760, %v5600_v3 }
  0x61   :  { %4260 = vmatmul.mubr.f32.gmra.mrb[10].mxu0 %v6741_v62  ;;  %6743 = vst [vmem:[#allocation41_spill] sm:$0xff] %v5649_v16  ;;  %v591_v54 = vand.u32 4294901760, %v590_v46  ;;  %4022 = vmatprep.mubr.f32.mxu1 %v306_v41  ;;  %v5657_v21 = vsub.f32 %v66_v7, %v5631_v22  ;;  %v6746_v11 = vand.u32 4294901760, %v5293_v47  ;;  %v6747_v15 = vand.u32 4294901760, %v5603_v56 }
  0x62   :  { %4262 = vmatprep.mubr.f32.mxu0 %v6744_v44  ;;  %v345_v38 = vsub.f32 %v5600_v3, %v6745_v26  ;;  %v598_v40 = vand.u32 4294901760, %v597_v29  ;;  %v5667_v44 = vsub.f32 %v67_v1, %v5638_v30  ;;  %4507 = vmatpush3.bf16.msra.mxu1 %v4504_v63  ;;  %v70_v26 = vld [vmem:[#allocation2 + $0xc0] sm:$0xff]  ;;  %v6748_v7 = vand.u32 4294901760, %v5295_v48 }
  0x63   :  { %v602_v62 = vsub.f32 %v5293_v47, %v6746_v11  ;;  %v355_v46 = vsub.f32 %v5603_v56, %v6747_v15  ;;  %4603 = vmatpush3.bf16.msra.mxu0 %v4600_v28  ;;  %v6749_v9 = vand.u32 4294901760, %v5613_v59  ;;  %v5675_v11 = vand.u32 4294901760, %v69_v52 }
  0x64   :  { %v609_v29 = vsub.f32 %v5295_v48, %v6748_v7  ;;  %v4508_v20 = vpack.c.bf16 %v598_v40, %v591_v54  ;;  %4605 = vmatprep.subr.bf16.mxu0 %v4604_v36  ;;  %4023 = vmatmul.mubr.f32.gmra.mrb[12].mxu1 %v316_v60  ;;  %v6750_v1 = vand.u32 4294901760, %v5533_v0  ;;  %v336_v63 = vand.u32 4294901760, %v335_v37  ;;  %v71_v54 = vld [vmem:[#allocation2 + $0xc8] sm:$0xff]  ;;  %v72_v37 = vld [vmem:[#allocation2 + $0xd0] sm:$0xff] }
  0x65   :  { %v365_v47 = vsub.f32 %v5613_v59, %v6749_v9  ;;  %v603_v15 = vand.u32 4294901760, %v602_v62  ;;  %v5680_v28 = vsub.f32 %v68_v55, %v5649_v16  ;;  %4025 = vmatprep.mubr.f32.mxu1 %v326_v6  ;;  %v6751_v48 = vand.u32 4294901760, %v5547_v14 }
  0x66   :  { %4263 = vmatmul.mubr.f32.gmra.mrb[12].mxu0 %v6750_v1  ;;  %v610_v41 = vand.u32 4294901760, %v609_v29  ;;  %v346_v7 = vand.u32 4294901760, %v345_v38  ;;  %v5685_v30 = vand.u32 4294901760, %v70_v26  ;;  %v356_v60 = vand.u32 4294901760, %v355_v46  ;;  %4509 = vmatprep.subr.bf16.mxu1 %v4508_v20 }
  0x67   :  { %4265 = vmatprep.mubr.f32.mxu0 %v6751_v48  ;;  %v604_v40 = vsub.f32 %v602_v62, %v603_v15  ;;  %4607 = vmatpush3.bf16.msra.mxu0 %v4604_v36  ;;  %v366_v16 = vand.u32 4294901760, %v365_v47  ;;  %v6752_v6 = vand.u32 4294901760, %v5636_v4  ;;  %v5692_v38 = vsub.f32 %v69_v52, %v5675_v11 }
  0x68   :  { %v611_v55 = vsub.f32 %v609_v29, %v610_v41  ;;  %v4608_v1 = vpack.c.bf16 %v610_v41, %v603_v15  ;;  %4511 = vmatpush3.bf16.msra.mxu1 %v4508_v20  ;;  %v6753_v46 = vand.u32 4294901760, %v5588_v8  ;;  %v404_v0 = vand.u32 4294901760, %v5680_v28 }
  0x69   :  { %v375_v48 = vsub.f32 %v5636_v4, %v6752_v6  ;;  %v605_v9 = vand.u32 4294901760, %v604_v40  ;;  %4026 = vmatmul.mubr.f32.gmra.mrb[14].mxu1 %v336_v63  ;;  %v5697_v14 = vand.u32 4294901760, %v71_v54  ;;  %v5701_v41 = vpack.c.bf16 %v5326_v58, %v5321_v57  ;;  %v73_v40 = vld [vmem:[#allocation2 + $0xd8] sm:$0xff] }
  0x6a   :  { %4266 = vmatmul.mubr.f32.gmra.mrb[14].mxu0 %v6753_v46  ;;  %v612_v36 = vand.u32 4294901760, %v611_v55  ;;  %4028 = vmatprep.mubr.f32.mxu1 %v346_v7  ;;  %v6754_v47 = vand.u32 4294901760, %v5600_v3  ;;  %v6755_v52 = vand.u32 4294901760, %v5657_v21  ;;  %v5709_v15 = vsub.f32 %v70_v26, %v5685_v30  ;;  %v74_v7 = vld [vmem:[#allocation2 + $0xe0] sm:$0xff] }
  0x6b   :  { %v5711_v63 = vand.u32 4294901760, %v72_v37  ;;  %v5715_v55 = vpack.c.bf16 %v5369_v34, %v5364_v32  ;;  %v6757_v57 = vand.u32 4294901760, %v5667_v44  ;;  %4609 = vmatprep.subr.bf16.mxu0 %v4608_v1  ;;  %v5722_v46 = vpack.c.bf16 %v5424_v31, %v5411_v35 }
  0x6c   :  { %4268 = vmatprep.mubr.f32.mxu0 %v6754_v47  ;;  %v385_v20 = vsub.f32 %v5657_v21, %v6755_v52  ;;  %6756 = vst [vmem:[#allocation42_spill] sm:$0xff] %v5709_v15  ;;  %v4512_v6 = vpack.c.bf16 %v612_v36, %v605_v9  ;;  %v5726_v26 = vpack.c.bf16 %v5505_v49, %v5490_v2  ;;  %v414_v47 = vand.u32 4294901760, %v5692_v38 }
  0x6d   :  { %v395_v58 = vsub.f32 %v5667_v44, %v6757_v57  ;;  %4611 = vmatpush3.bf16.msra.mxu0 %v4608_v1  ;;  %v5731_v32 = vpack.c.bf16 %v5559_v61, %v5554_v24  ;;  %v5735_v34 = vpack.c.bf16 %v5618_v50, %v5610_v51  ;;  %v5737_v9 = vpack.c.bf16 %v609_v29, %v602_v62  ;;  %v76_v1 = vld [vmem:[#allocation2 + $0xf0] sm:$0xff] }
  0x6e   :  { %4029 = vmatmul.mubr.f32.gmra.mrb[16].mxu1 %v356_v60  ;;  %v6758_v35 = vand.u32 4294901760, %v5603_v56  ;;  %v376_v31 = vand.u32 4294901760, %v375_v48  ;;  %v405_v49 = vsub.f32 %v5680_v28, %v404_v0  ;;  %v5745_v2 = vsub.f32 %v71_v54, %v5697_v14  ;;  %v75_v60 = vld [vmem:[#allocation2 + $0xe8] sm:$0xff]  ;;  %4513 = vmatprep.subr.bf16.mxu1 %v4512_v6 }
  0x6f   :  { %v5747_v24 = vand.u32 4294901760, %v73_v40  ;;  %4031 = vmatprep.mubr.f32.mxu1 %v366_v16  ;;  %v6760_v61 = vand.u32 4294901760, %v5613_v59  ;;  %v386_v51 = vand.u32 4294901760, %v385_v20  ;;  %v424_v50 = vand.u32 4294901760, %v5709_v15  ;;  %4613 = vmatprep.subr.bf16.mxu0 %v5211_v10 }
  0x70   :  { %4269 = vmatmul.mubr.f32.gmra.mrb[16].mxu0 %v6758_v35  ;;  %6759 = vst [vmem:[#allocation43_spill] sm:$0xff] %v5745_v2  ;;  %v5753_v62 = vsub.f32 %v72_v37, %v5711_v63  ;;  %v5755_v29 = vand.u32 4294901760, %v74_v7  ;;  %v5759_v54 = vpack.c.bf16 %v5286_v42, %v5274_v39  ;;  %v396_v16 = vand.u32 4294901760, %v395_v58  ;;  %4515 = vmatpush3.bf16.msra.mxu1 %v4512_v6 }
  0x71   :  { %4271 = vmatprep.mubr.f32.mxu0 %v6760_v61  ;;  %v415_v48 = vsub.f32 %v5692_v38, %v414_v47  ;;  %v6762_v36 = vand.u32 4294901760, %v5636_v4  ;;  %v406_v37 = vand.u32 4294901760, %v405_v49  ;;  %v434_v52 = vand.u32 4294901760, %v5745_v2 }
  0x72   :  { %6761 = vst [vmem:[#allocation44_spill] sm:$0xff] %v5753_v62  ;;  %4032 = vmatmul.mubr.f32.gmra.mrb[18].mxu1 %v376_v31  ;;  %v5767_v20 = vsub.f32 %v73_v40, %v5747_v24  ;;  %v5769_v57 = vand.u32 4294901760, %v75_v60  ;;  %v6763_v39 = vand.u32 4294901760, %v5657_v21  ;;  %v425_v42 = vsub.f32 %v5709_v15, %v424_v50  ;;  %v77_v31 = vld [vmem:[#allocation2 + $0xf8] sm:$0xff]  ;;  %4517 = vmatprep.subr.bf16.mxu1 %v5759_v54 }
  0x73   :  { %4034 = vmatprep.mubr.f32.mxu1 %v386_v51  ;;  %v444_v58 = vand.u32 4294901760, %v5753_v62  ;;  %v5776_v6 = vsub.f32 %v74_v7, %v5755_v29  ;;  %v5778_v35 = vand.u32 4294901760, %v76_v1  ;;  %v416_v40 = vand.u32 4294901760, %v415_v48 }
  0x74   :  { %4272 = vmatmul.mubr.f32.gmra.mrb[18].mxu0 %v6762_v36  ;;  %v6764_v49 = vand.u32 4294901760, %v5667_v44  ;;  %v435_v61 = vsub.f32 %v5745_v2, %v434_v52  ;;  %v454_v51 = vand.u32 4294901760, %v5767_v20  ;;  %v5786_v36 = vsub.f32 %v75_v60, %v5769_v57 }
  0x75   :  { %4274 = vmatprep.mubr.f32.mxu0 %v6763_v39  ;;  %v5788_v39 = vand.u32 4294901760, %v77_v31  ;;  %v426_v7 = vand.u32 4294901760, %v425_v42  ;;  %v445_v48 = vsub.f32 %v5753_v62, %v444_v58 }
  0x76   :  { %4035 = vmatmul.mubr.f32.gmra.mrb[20].mxu1 %v396_v16  ;;  %v464_v16 = vand.u32 4294901760, %v5776_v6  ;;  %v436_v2 = vand.u32 4294901760, %v435_v61  ;;  %v455_v60 = vsub.f32 %v5767_v20, %v454_v51  ;;  %v474_v15 = vand.u32 4294901760, %v5786_v36 }
  0x77   :  { %4037 = vmatprep.mubr.f32.mxu1 %v406_v37  ;;  %v5800_v37 = vsub.f32 %v77_v31, %v5788_v39 }
  0x78   :  { %4275 = vmatmul.mubr.f32.gmra.mrb[20].mxu0 %v6764_v49  ;;  %v5795_v49 = vsub.f32 %v76_v1, %v5778_v35  ;;  %v465_v42 = vsub.f32 %v5776_v6, %v464_v16  ;;  %v456_v1 = vand.u32 4294901760, %v455_v60  ;;  %v6782_v60 = vld [vmem:[#allocation14_spill] sm:$0xff] }
  0x79   :  { %4277 = vmatprep.mubr.f32.mxu0 %v404_v0  ;;  %v446_v0 = vand.u32 4294901760, %v445_v48 }
  0x7a   :  { %4038 = vmatmul.mubr.f32.gmra.mrb[22].mxu1 %v416_v40  ;;  %v484_v62 = vand.u32 4294901760, %v5795_v49  ;;  %v494_v40 = vand.u32 4294901760, %v5800_v37  ;;  %v466_v61 = vand.u32 4294901760, %v465_v42  ;;  %v6784_v42 = vld [vmem:[#allocation17_spill] sm:$0xff] }
  0x7b   :  { %4040 = vmatprep.mubr.f32.mxu1 %v426_v7 }
  0x7c   :  { %4278 = vmatmul.mubr.f32.gmra.mrb[22].mxu0 %v414_v47  ;;  %v475_v47 = vsub.f32 %v5786_v36, %v474_v15  ;;  %v485_v31 = vsub.f32 %v5795_v49, %v484_v62  ;;  %v495_v7 = vsub.f32 %v5800_v37, %v494_v40 }
  0x7d   :  { %4280 = vmatprep.mubr.f32.mxu0 %v424_v50 }
  0x7e   :  { %4041 = vmatmul.mubr.f32.gmra.mrb[24].mxu1 %v436_v2  ;;  %v476_v50 = vand.u32 4294901760, %v475_v47  ;;  %v486_v48 = vand.u32 4294901760, %v485_v31  ;;  %v496_v2 = vand.u32 4294901760, %v495_v7  ;;  %v6786_v47 = vld [vmem:[#allocation24_spill] sm:$0xff]  ;;  %v6794_v31 = vld [vmem:[#allocation37_spill] sm:$0xff] }
  0x7f   :  { %4043 = vmatprep.mubr.f32.mxu1 %v446_v0  ;;  %v6783_v0 = vld [vmem:[#allocation16_spill] sm:$0xff] }
  0x80   :  { %4281 = vmatmul.mubr.f32.gmra.mrb[24].mxu0 %v434_v52  ;;  %v6775_v52 = vld [vmem:[#allocation33_spill] sm:$0xff] }
  0x81   :  { %4283 = vmatprep.mubr.f32.mxu0 %v444_v58  ;;  %v6776_v58 = vld [vmem:[#allocation36_spill] sm:$0xff] }
  0x82   :  { %4044 = vmatmul.mubr.f32.gmra.mrb[26].mxu1 %v456_v1  ;;  %v6785_v1 = vld [vmem:[#allocation19_spill] sm:$0xff] }
  0x83   :  { %4046 = vmatprep.mubr.f32.mxu1 %v466_v61  ;;  %v6793_v61 = vld [vmem:[#allocation35_spill] sm:$0xff] }
  0x84   :  { %4284 = vmatmul.mubr.f32.gmra.mrb[26].mxu0 %v454_v51  ;;  %v6779_v51 = vld [vmem:[#allocation40_spill] sm:$0xff] }
  0x85   :  { %4286 = vmatprep.mubr.f32.mxu0 %v464_v16  ;;  %v6781_v16 = vld [vmem:[#allocation11_spill] sm:$0xff] }
  0x86   :  { %4047 = vmatmul.mubr.f32.gmra.mrb[28].mxu1 %v476_v50  ;;  %v6795_v50 = vld [vmem:[#allocation38_spill] sm:$0xff] }
  0x87   :  { %4049 = vmatprep.mubr.f32.mxu1 %v486_v48 }
  0x88   :  { %4287 = vmatmul.mubr.f32.gmra.mrb[28].mxu0 %v474_v15  ;;  %v6766_v15 = vld [vmem:[#allocation22_spill] sm:$0xff] }
  0x89   :  { %4289 = vmatprep.mubr.f32.mxu0 %v484_v62  ;;  %v6769_v62 = vld [vmem:[#allocation25_spill] sm:$0xff] }
  0x8a   :  { %4050 = vmatmul.mubr.f32.gmra.mrb[30].mxu1 %v496_v2 }
  0x8b   :  { %4084 = vmatprep.mubr.f32.mxu1 %v5229_v17 }
  0x8c   :  { %4290 = vmatmul.mubr.f32.gmra.mrb[30].mxu0 %v494_v40  ;;  %v6792_v40 = vld [vmem:[#allocation34_spill] sm:$0xff] }
  0x8d   :  { %4324 = vmatprep.mubr.f32.mxu0 %v5229_v17 }
  0x8e   :  { %4085 = vmatmul.mubr.f32.vlgmr.msra.gmra.mrb[0].mxu1 %v5266_v33 }
  0x8f   :  { %4519 = vmatpush3.bf16.msra.mxu1 %v5759_v54  ;;  %4087 = vmatprep.mubr.f32.mxu1 %v5288_v43  ;;  %v6772_v54 = vld [vmem:[#allocation31_spill] sm:$0xff] }
  0x90   :  { %4325 = vmatmul.mubr.f32.vlgmr.msra.gmra.mrb[0].mxu0 %v5266_v33  ;;  %4521 = vmatprep.subr.bf16.mxu1 %v5701_v41 }
  0x91   :  { %4327 = vmatprep.mubr.f32.mxu0 %v5288_v43  ;;  %4615 = vmatpush3.bf16.msra.mxu0 %v5211_v10  ;;  %v6765_v10 = vld [vmem:[#allocation20_spill] sm:$0xff] }
  0x92   :  { %4617 = vmatprep.subr.bf16.mxu0 %v5219_v13  ;;  %4088 = vmatmul.mubr.f32.gmra.mrb[2].mxu1 %v5290_v45 }
  0x93   :  { %4090 = vmatprep.mubr.f32.mxu1 %v5310_v53  ;;  %4523 = vmatpush3.bf16.msra.mxu1 %v5701_v41  ;;  %v6767_v41 = vld [vmem:[#allocation12_spill] sm:$0xff] }
  0x94   :  { %4328 = vmatmul.mubr.f32.gmra.mrb[2].mxu0 %v5290_v45  ;;  %4525 = vmatprep.subr.bf16.mxu1 %v5715_v55 }
  0x95   :  { %4330 = vmatprep.mubr.f32.mxu0 %v5310_v53  ;;  %4619 = vmatpush3.bf16.msra.mxu0 %v5219_v13  ;;  %v6768_v13 = vld [vmem:[#allocation23_spill] sm:$0xff] }
  0x96   :  { %4621 = vmatprep.subr.bf16.mxu0 %v5237_v18  ;;  %4091 = vmatmul.mubr.f32.gmra.mrb[4].mxu1 %v6765_v10 }
  0x97   :  { %4093 = vmatprep.mubr.f32.mxu1 %v6766_v15  ;;  %4527 = vmatpush3.bf16.msra.mxu1 %v5715_v55  ;;  %v6770_v55 = vld [vmem:[#allocation13_spill] sm:$0xff] }
  0x98   :  { %4331 = vmatmul.mubr.f32.gmra.mrb[4].mxu0 %v6765_v10  ;;  %4529 = vmatprep.subr.bf16.mxu1 %v5722_v46 }
  0x99   :  { %4333 = vmatprep.mubr.f32.mxu0 %v6766_v15  ;;  %4623 = vmatpush3.bf16.msra.mxu0 %v5237_v18  ;;  %v6771_v18 = vld [vmem:[#allocation28_spill] sm:$0xff] }
  0x9a   :  { %4625 = vmatprep.subr.bf16.mxu0 %v6767_v41  ;;  %4094 = vmatmul.mubr.f32.gmra.mrb[6].mxu1 %v6768_v13 }
  0x9b   :  { %4096 = vmatprep.mubr.f32.mxu1 %v6769_v62  ;;  %4531 = vmatpush3.bf16.msra.mxu1 %v5722_v46  ;;  %v6773_v46 = vld [vmem:[#allocation15_spill] sm:$0xff] }
  0x9c   :  { %4334 = vmatmul.mubr.f32.gmra.mrb[6].mxu0 %v6768_v13  ;;  %4533 = vmatprep.subr.bf16.mxu1 %v5726_v26 }
  0x9d   :  { %4336 = vmatprep.mubr.f32.mxu0 %v6769_v62  ;;  %4627 = vmatpush3.bf16.msra.mxu0 %v6767_v41 }
  0x9e   :  { %4629 = vmatprep.subr.bf16.mxu0 %v6770_v55  ;;  %4097 = vmatmul.mubr.f32.gmra.mrb[8].mxu1 %v6771_v18 }
  0x9f   :  { %4099 = vmatprep.mubr.f32.mxu1 %v6772_v54  ;;  %4535 = vmatpush3.bf16.msra.mxu1 %v5726_v26  ;;  %v6774_v26 = vld [vmem:[#allocation18_spill] sm:$0xff] }
  0xa0   :  { %4337 = vmatmul.mubr.f32.gmra.mrb[8].mxu0 %v6771_v18  ;;  %4537 = vmatprep.subr.bf16.mxu1 %v5731_v32 }
  0xa1   :  { %4339 = vmatprep.mubr.f32.mxu0 %v6772_v54  ;;  %4631 = vmatpush3.bf16.msra.mxu0 %v6770_v55 }
  0xa2   :  { %4633 = vmatprep.subr.bf16.mxu0 %v6773_v46  ;;  %4100 = vmatmul.mubr.f32.gmra.mrb[10].mxu1 %v5466_v25 }
  0xa3   :  { %4102 = vmatprep.mubr.f32.mxu1 %v5468_v19  ;;  %4539 = vmatpush3.bf16.msra.mxu1 %v5731_v32  ;;  %v6777_v32 = vld [vmem:[#allocation21_spill] sm:$0xff] }
  0xa4   :  { %4340 = vmatmul.mubr.f32.gmra.mrb[10].mxu0 %v5466_v25  ;;  %4541 = vmatprep.subr.bf16.mxu1 %v5735_v34 }
  0xa5   :  { %4342 = vmatprep.mubr.f32.mxu0 %v5468_v19  ;;  %4635 = vmatpush3.bf16.msra.mxu0 %v6773_v46 }
  0xa6   :  { %4637 = vmatprep.subr.bf16.mxu0 %v6774_v26  ;;  %4103 = vmatmul.mubr.f32.gmra.mrb[12].mxu1 %v6775_v52 }
  0xa7   :  { %4105 = vmatprep.mubr.f32.mxu1 %v6776_v58  ;;  %4543 = vmatpush3.bf16.msra.mxu1 %v5735_v34  ;;  %v6778_v34 = vld [vmem:[#allocation39_spill] sm:$0xff] }
  0xa8   :  { %4343 = vmatmul.mubr.f32.gmra.mrb[12].mxu0 %v6775_v52  ;;  %4545 = vmatprep.subr.bf16.mxu1 %v5737_v9 }
  0xa9   :  { %4345 = vmatprep.mubr.f32.mxu0 %v6776_v58  ;;  %4639 = vmatpush3.bf16.msra.mxu0 %v6774_v26 }
  0xaa   :  { %4641 = vmatprep.subr.bf16.mxu0 %v6777_v32  ;;  %4106 = vmatmul.mubr.f32.gmra.mrb[14].mxu1 %v5549_v5 }
  0xab   :  { %4108 = vmatprep.mubr.f32.mxu1 %v5567_v27  ;;  %4547 = vmatpush3.bf16.msra.mxu1 %v5737_v9  ;;  %v6780_v9 = vld [vmem:[#allocation41_spill] sm:$0xff] }
  0xac   :  { %4346 = vmatmul.mubr.f32.gmra.mrb[14].mxu0 %v5549_v5 }
  0xad   :  { %4348 = vmatprep.mubr.f32.mxu0 %v5567_v27  ;;  %4643 = vmatpush3.bf16.msra.mxu0 %v6777_v32 }
  0xae   :  { %4109 = vmatmul.mubr.f32.gmra.mrb[16].mxu1 %v5569_v23 }
  0xaf   :  { %4111 = vmatprep.mubr.f32.mxu1 %v5582_v12 }
  0xb0   :  { %4349 = vmatmul.mubr.f32.gmra.mrb[16].mxu0 %v5569_v23 }
  0xb1   :  { %4351 = vmatprep.mubr.f32.mxu0 %v5582_v12 }
  0xb2   :  { %4112 = vmatmul.mubr.f32.gmra.mrb[18].mxu1 %v6778_v34 }
  0xb3   :  { %4114 = vmatprep.mubr.f32.mxu1 %v5631_v22 }
  0xb4   :  { %4352 = vmatmul.mubr.f32.gmra.mrb[18].mxu0 %v6778_v34 }
  0xb5   :  { %4354 = vmatprep.mubr.f32.mxu0 %v5631_v22 }
  0xb6   :  { %4115 = vmatmul.mubr.f32.gmra.mrb[20].mxu1 %v6779_v51 }
  0xb7   :  { %4117 = vmatprep.mubr.f32.mxu1 %v6780_v9 }
  0xb8   :  { %4355 = vmatmul.mubr.f32.gmra.mrb[20].mxu0 %v6779_v51 }
  0xb9   :  { %4357 = vmatprep.mubr.f32.mxu0 %v6780_v9 }
  0xba   :  { %4118 = vmatmul.mubr.f32.gmra.mrb[22].mxu1 %v5675_v11 }
  0xbb   :  { %4120 = vmatprep.mubr.f32.mxu1 %v5685_v30 }
  0xbc   :  { %4358 = vmatmul.mubr.f32.gmra.mrb[22].mxu0 %v5675_v11 }
  0xbd   :  { %4360 = vmatprep.mubr.f32.mxu0 %v5685_v30 }
  0xbe   :  { %4121 = vmatmul.mubr.f32.gmra.mrb[24].mxu1 %v5697_v14 }
  0xbf   :  { %4123 = vmatprep.mubr.f32.mxu1 %v5711_v63 }
  0xc0   :  { %4361 = vmatmul.mubr.f32.gmra.mrb[24].mxu0 %v5697_v14 }
  0xc1   :  { %4363 = vmatprep.mubr.f32.mxu0 %v5711_v63 }
  0xc2   :  { %4124 = vmatmul.mubr.f32.gmra.mrb[26].mxu1 %v5747_v24 }
  0xc3   :  { %4126 = vmatprep.mubr.f32.mxu1 %v5755_v29 }
  0xc4   :  { %4364 = vmatmul.mubr.f32.gmra.mrb[26].mxu0 %v5747_v24 }
  0xc5   :  { %4366 = vmatprep.mubr.f32.mxu0 %v5755_v29 }
  0xc6   :  { %4127 = vmatmul.mubr.f32.gmra.mrb[28].mxu1 %v5769_v57 }
  0xc7   :  { %4129 = vmatprep.mubr.f32.mxu1 %v5778_v35 }
  0xc8   :  { %4367 = vmatmul.mubr.f32.gmra.mrb[28].mxu0 %v5769_v57 }
  0xc9   :  { %4369 = vmatprep.mubr.f32.mxu0 %v5778_v35 }
  0xca   :  { %4130 = vmatmul.mubr.f32.gmra.mrb[30].mxu1 %v5788_v39 }
  0xcb   :  { %4164 = vmatprep.mubr.f32.mxu1 %v6781_v16 }
  0xcc   :  { %4370 = vmatmul.mubr.f32.gmra.mrb[30].mxu0 %v5788_v39 }
  0xcd   :  { %4404 = vmatprep.mubr.f32.mxu0 %v5229_v17  ;;  %v6787_v17 = vld [vmem:[#allocation26_spill] sm:$0xff] }
  0xce   :  { %4165 = vmatmul.mubr.f32.vlgmr.msra.gmra.mrb[0].mxu1 %v6782_v60 }
  0xcf   :  { %4167 = vmatprep.mubr.f32.mxu1 %v6783_v0 }
  0xd0   :  { %4405 = vmatmul.mubr.f32.vlgmr.msra.gmra.mrb[0].mxu0 %v5266_v33  ;;  %v6788_v33 = vld [vmem:[#allocation27_spill] sm:$0xff] }
  0xd1   :  { %4407 = vmatprep.mubr.f32.mxu0 %v5288_v43  ;;  %v6789_v43 = vld [vmem:[#allocation29_spill] sm:$0xff] }
  0xd2   :  { %4168 = vmatmul.mubr.f32.gmra.mrb[2].mxu1 %v6784_v42 }
  0xd3   :  { %4170 = vmatprep.mubr.f32.mxu1 %v6785_v1 }
  0xd4   :  { %4408 = vmatmul.mubr.f32.gmra.mrb[2].mxu0 %v5290_v45  ;;  %v6790_v45 = vld [vmem:[#allocation30_spill] sm:$0xff] }
  0xd5   :  { %4410 = vmatprep.mubr.f32.mxu0 %v5310_v53  ;;  %v6791_v53 = vld [vmem:[#allocation32_spill] sm:$0xff] }
  0xd6   :  { %4171 = vmatmul.mubr.f32.gmra.mrb[4].mxu1 %v6786_v47 }
  0xd7   :  { %4173 = vmatprep.mubr.f32.mxu1 %v6787_v17 }
  0xd8   :  { %4411 = vmatmul.mubr.f32.gmra.mrb[4].mxu0 %v6765_v10  ;;  %v5981_v10 = vld [vmem:[%s6613_s3] ss:$0 sm:$0xff]  ;;  %s5145_s3 = smov [#allocation7]  }
  0xd9   :  { %4413 = vmatprep.mubr.f32.mxu0 %v6766_v15  ;;  %s3669_s16 = sshll.u32 %s5145_s3, 4  ;;  %s3670_s16 = int_to_ptr.vmem [resolvable:$true] %s3669_s16 }
  0xda   :  { %4174 = vmatmul.mubr.f32.gmra.mrb[6].mxu1 %v6788_v33  ;;  %s5112_s17 = scalar_lea.vmem %s3670_s16, 512  ;;  %p5117_p3 = scmp.lt.s32.totalorder %s3670_s16, %s3670_s16 }
  0xdb   :  { %4176 = vmatprep.mubr.f32.mxu1 %v6789_v43  ;;  %p5113_p2 = scmp.ne.s32.totalorder %s3670_s16, %s5112_s17  ;;  %p5118_p4 = scmp.lt.s32.totalorder %s5112_s17, %s5112_s17 }
  0xdc   :  { %4414 = vmatmul.mubr.f32.gmra.mrb[6].mxu0 %v6768_v13 }
  0xdd   :  { %4416 = vmatprep.mubr.f32.mxu0 %v6769_v62  ;;  %p5119_p5 = por %p5118_p4, %p5117_p3 }
  0xde   :  { %4177 = vmatmul.mubr.f32.gmra.mrb[8].mxu1 %v6790_v45 }
  0xdf   :  { %4179 = vmatprep.mubr.f32.mxu1 %v6791_v53  ;;  %p5120_p6 = pnand %p5119_p5, %p5113_p2 }
  0xe0   :  { %4417 = vmatmul.mubr.f32.gmra.mrb[8].mxu0 %v6771_v18 }
  0xe1   :  { %4419 = vmatprep.mubr.f32.mxu0 %v6772_v54 }
  0xe2   :  { %4180 = vmatmul.mubr.f32.gmra.mrb[10].mxu1 %v6792_v40 }
  0xe3   :  { %4182 = vmatprep.mubr.f32.mxu1 %v6793_v61 }
  0xe4   :  { %4420 = vmatmul.mubr.f32.gmra.mrb[10].mxu0 %v5466_v25  ;;  %v6796_v25 = vld [vmem:[#allocation42_spill] sm:$0xff] }
  0xe5   :  { %4422 = vmatprep.mubr.f32.mxu0 %v5468_v19  ;;  %v6798_v19 = vld [vmem:[#allocation44_spill] sm:$0xff] }
  0xe6   :  { %4183 = vmatmul.mubr.f32.gmra.mrb[12].mxu1 %v6794_v31 }
  0xe7   :  { %4185 = vmatprep.mubr.f32.mxu1 %v6795_v50 }
  0xe8   :  { %4423 = vmatmul.mubr.f32.gmra.mrb[12].mxu0 %v6775_v52 }
  0xe9   :  { %4425 = vmatprep.mubr.f32.mxu0 %v6776_v58 }
  0xea   :  { %4186 = vmatmul.mubr.f32.gmra.mrb[14].mxu1 %v5588_v8  ;;  %v6797_v8 = vld [vmem:[#allocation43_spill] sm:$0xff] }
  0xeb   :  { %4188 = vmatprep.mubr.f32.mxu1 %v5600_v3 }
  0xec   :  { %4426 = vmatmul.mubr.f32.gmra.mrb[14].mxu0 %v5549_v5  ;;  %v5969_v5 = vld [vmem:[%s6612_s2] ss:$0 sm:$0xff] }
  0xed   :  { %4428 = vmatprep.mubr.f32.mxu0 %v5567_v27 }
  0xee   :  { %4189 = vmatmul.mubr.f32.gmra.mrb[16].mxu1 %v5603_v56 }
  0xef   :  { %4191 = vmatprep.mubr.f32.mxu1 %v5613_v59 }
  0xf0   :  { %4429 = vmatmul.mubr.f32.gmra.mrb[16].mxu0 %v5569_v23 }
  0xf1   :  { %4431 = vmatprep.mubr.f32.mxu0 %v5582_v12 }
  0xf2   :  { %4192 = vmatmul.mubr.f32.gmra.mrb[18].mxu1 %v5636_v4 }
  0xf3   :  { %4194 = vmatprep.mubr.f32.mxu1 %v5657_v21 }
  0xf4   :  { %4432 = vmatmul.mubr.f32.gmra.mrb[18].mxu0 %v6778_v34 }
  0xf5   :  { %4434 = vmatprep.mubr.f32.mxu0 %v5631_v22 }
  0xf6   :  { %4195 = vmatmul.mubr.f32.gmra.mrb[20].mxu1 %v5667_v44 }
  0xf7   :  { %4197 = vmatprep.mubr.f32.mxu1 %v5680_v28 }
  0xf8   :  { %4435 = vmatmul.mubr.f32.gmra.mrb[20].mxu0 %v6779_v51 }
  0xf9   :  { %4437 = vmatprep.mubr.f32.mxu0 %v6780_v9 }
  0xfa   :  { %4198 = vmatmul.mubr.f32.gmra.mrb[22].mxu1 %v5692_v38 }
  0xfb   :  { %4200 = vmatprep.mubr.f32.mxu1 %v6796_v25 }
  0xfc   :  { %4438 = vmatmul.mubr.f32.gmra.mrb[22].mxu0 %v5675_v11 }
  0xfd   :  { %4440 = vmatprep.mubr.f32.mxu0 %v5685_v30 }
  0xfe   :  { %4201 = vmatmul.mubr.f32.gmra.mrb[24].mxu1 %v6797_v8 }
  0xff   :  { %4203 = vmatprep.mubr.f32.mxu1 %v6798_v19 }
 0x100   :  { %4441 = vmatmul.mubr.f32.gmra.mrb[24].mxu0 %v5697_v14 }
 0x101   :  { %4443 = vmatprep.mubr.f32.mxu0 %v5711_v63 }
 0x102   :  { %4204 = vmatmul.mubr.f32.gmra.mrb[26].mxu1 %v5767_v20 }
 0x103   :  { %4206 = vmatprep.mubr.f32.mxu1 %v5776_v6 }
 0x104   :  { %4444 = vmatmul.mubr.f32.gmra.mrb[26].mxu0 %v5747_v24 }
 0x105   :  { %4446 = vmatprep.mubr.f32.mxu0 %v5755_v29 }
 0x106   :  { %4207 = vmatmul.mubr.f32.gmra.mrb[28].mxu1 %v5786_v36 }
 0x107   :  { %4209 = vmatprep.mubr.f32.mxu1 %v5795_v49 }
 0x108   :  { %4447 = vmatmul.mubr.f32.gmra.mrb[28].mxu0 %v5769_v57 }
 0x109   :  { %4449 = vmatprep.mubr.f32.mxu0 %v5778_v35 }
 0x10a   :  { %4210 = vmatmul.mubr.f32.gmra.mrb[30].mxu1 %v5800_v37 }
 0x10c   :  { %4450 = vmatmul.mubr.f32.gmra.mrb[30].mxu0 %v5788_v39 }
 0x1a1   :  { %v4166_v14 = vpop.f32.mrb[0].mxu1 }
 0x1a2   :  { %v4644_v23 = vadd.f32 %v4166_v14, %v5969_v5  ;;  %v939_v12 = vpop.f32.mrb[1].mxu1 }
 0x1a3   :  { %v4406_v27 = vpop.f32.mrb[0].mxu0  ;;  %v4646_v56 = vadd.f32 %v5969_v5, %v939_v12 }
 0x1a4   :  { %v1885_v3 = vpop.f32.mrb[1].mxu0  ;;  %v4645_v59 = vadd.f32 %v4644_v23, %v4406_v27 }
 0x1a5   :  { %v4647_v22 = vadd.f32 %v4646_v56, %v1885_v3  ;;  %v4169_v4 = vpop.f32.mrb[2].mxu1 }
 0x1a6   :  { %4844 = vtanh.f32 %v4645_v59  ;;  %v4648_v21 = vadd.f32 %v4169_v4, %v5969_v5  ;;  %v953_v44 = vpop.f32.mrb[3].mxu1 }
 0x1a7   :  { %v4409_v30 = vpop.f32.mrb[2].mxu0  ;;  %v4650_v28 = vadd.f32 %v5969_v5, %v953_v44  ;;  %4846 = vtanh.f32 %v4647_v22 }
 0x1a8   :  { %v1897_v11 = vpop.f32.mrb[3].mxu0  ;;  %v4649_v38 = vadd.f32 %v4648_v21, %v4409_v30 }
 0x1a9   :  { %v4651_v63 = vadd.f32 %v4650_v28, %v1897_v11  ;;  %v4172_v24 = vpop.f32.mrb[4].mxu1 }
 0x1aa   :  { %v4652_v20 = vadd.f32 %v4172_v24, %v5969_v5  ;;  %v967_v57 = vpop.f32.mrb[5].mxu1  ;;  %4848 = vtanh.f32 %v4649_v38 }
 0x1ab   :  { %v4412_v29 = vpop.f32.mrb[4].mxu0  ;;  %v4654_v35 = vadd.f32 %v5969_v5, %v967_v57  ;;  %4850 = vtanh.f32 %v4651_v63 }
 0x1ac   :  { %v1909_v6 = vpop.f32.mrb[5].mxu0  ;;  %v4653_v36 = vadd.f32 %v4652_v20, %v4412_v29 }
 0x1ad   :  { %v4655_v39 = vadd.f32 %v4654_v35, %v1909_v6  ;;  %v4175_v49 = vpop.f32.mrb[6].mxu1 }
 0x1ae   :  { %v4656_v7 = vadd.f32 %v4175_v49, %v5969_v5  ;;  %v981_v48 = vpop.f32.mrb[7].mxu1  ;;  %4852 = vtanh.f32 %v4653_v36 }
 0x1af   :  { %v4415_v37 = vpop.f32.mrb[6].mxu0  ;;  %v4658_v15 = vadd.f32 %v5969_v5, %v981_v48 }
 0x1b0   :  { %v1921_v2 = vpop.f32.mrb[7].mxu0  ;;  %v4845_v41 = vpop.eup %4844  ;;  %v5984_v13 = vadd.f32 %v4656_v7, %v4415_v37 }
 0x1b1   :  { %v4659_v62 = vadd.f32 %v4658_v15, %v1921_v2  ;;  %v4178_v55 = vpop.f32.mrb[8].mxu1  ;;  %v2115_v54 = vmul.f32 %v4845_v41, %v5981_v10  ;;  %v4847_v46 = vpop.eup %4846 }
 0x1b2   :  { %v4660_v26 = vadd.f32 %v4178_v55, %v5969_v5  ;;  %v995_v52 = vpop.f32.mrb[9].mxu1  ;;  %v2114_v60 = vmul.f32 %v4847_v46, %v5981_v10 }
 0x1b3   :  { %v4418_v18 = vpop.f32.mrb[8].mxu0  ;;  %v4662_v32 = vadd.f32 %v5969_v5, %v995_v52  ;;  %2148 = vadd.xlane.f32.xlu0 %v2115_v54 }
 0x1b4   :  { %v1933_v58 = vpop.f32.mrb[9].mxu0  ;;  %v4661_v34 = vadd.f32 %v4660_v26, %v4418_v18  ;;  %v4849_v0 = vpop.eup %4848 }
 0x1b5   :  { %v4663_v51 = vadd.f32 %v4662_v32, %v1933_v58  ;;  %v4181_v9 = vpop.f32.mrb[10].mxu1  ;;  %v2117_v40 = vmul.f32 %v4849_v0, %v5981_v10  ;;  %v4851_v61 = vpop.eup %4850 }
 0x1b6   :  { %4854 = vtanh.f32 %v4661_v34  ;;  %v4664_v42 = vadd.f32 %v4181_v9, %v5969_v5  ;;  %v1009_v1 = vpop.f32.mrb[11].mxu1  ;;  %v2116_v12 = vmul.f32 %v4851_v61, %v5981_v10 }
 0x1b7   :  { %v4421_v16 = vpop.f32.mrb[10].mxu0  ;;  %4856 = vtanh.f32 %v4655_v39  ;;  %v4666_v17 = vadd.f32 %v5969_v5, %v1009_v1  ;;  %2146 = vadd.xlane.f32.xlu0 %v2114_v60 }
 0x1b8   :  { %v1945_v47 = vpop.f32.mrb[11].mxu0  ;;  %4858 = vtanh.f32 %v4663_v51  ;;  %v4665_v33 = vadd.f32 %v4664_v42, %v4421_v16  ;;  %v4853_v3 = vpop.eup %4852 }
 0x1b9   :  { %v4667_v43 = vadd.f32 %v4666_v17, %v1945_v47  ;;  %v4184_v45 = vpop.f32.mrb[12].mxu1  ;;  %4860 = vtanh.f32 %v4659_v62  ;;  %v2119_v63 = vmul.f32 %v4853_v3, %v5981_v10 }
 0x1ba   :  { %v4668_v31 = vadd.f32 %v4184_v45, %v5969_v5  ;;  %v1023_v50 = vpop.f32.mrb[13].mxu1  ;;  %4862 = vtanh.f32 %v4665_v33 }
 0x1bb   :  { %v4424_v53 = vpop.f32.mrb[12].mxu0  ;;  %v4670_v8 = vadd.f32 %v5969_v5, %v1023_v50  ;;  %2152 = vadd.xlane.f32.xlu0 %v2117_v40  ;;  %4864 = vtanh.f32 %v4667_v43 }
 0x1bc   :  { %v1957_v25 = vpop.f32.mrb[13].mxu0  ;;  %v4669_v19 = vadd.f32 %v4668_v31, %v4424_v53 }
 0x1bd   :  { %v4671_v14 = vadd.f32 %v4670_v8, %v1957_v25  ;;  %v4187_v27 = vpop.f32.mrb[14].mxu1 }
 0x1be   :  { %v4672_v56 = vadd.f32 %v4187_v27, %v5969_v5  ;;  %v1037_v59 = vpop.f32.mrb[15].mxu1  ;;  %4866 = vtanh.f32 %v4669_v19 }
 0x1bf   :  { %v4427_v23 = vpop.f32.mrb[14].mxu0  ;;  %v4674_v4 = vadd.f32 %v5969_v5, %v1037_v59  ;;  %2150 = vadd.xlane.f32.xlu0 %v2116_v12 }
 0x1c0   :  { %v1969_v22 = vpop.f32.mrb[15].mxu0  ;;  %v4855_v30 = vpop.eup %4854  ;;  %v5998_v21 = vadd.f32 %v4672_v56, %v4427_v23 }
 0x1c1   :  { %v4857_v44 = vpop.eup %4856  ;;  %v4675_v11 = vadd.f32 %v4674_v4, %v1969_v22  ;;  %v4190_v28 = vpop.f32.mrb[16].mxu1  ;;  %v2123_v24 = vmul.f32 %v4855_v30, %v5981_v10 }
 0x1c2   :  { %v4859_v29 = vpop.eup %4858  ;;  %v4676_v20 = vadd.f32 %v4190_v28, %v5969_v5  ;;  %v1051_v57 = vpop.f32.mrb[17].mxu1  ;;  %v2118_v48 = vmul.f32 %v4857_v44, %v5981_v10 }
 0x1c3   :  { %v4430_v38 = vpop.f32.mrb[16].mxu0  ;;  %v4678_v35 = vadd.f32 %v5969_v5, %v1051_v57  ;;  %2156 = vadd.xlane.f32.xlu0 %v2119_v63  ;;  %2164 = vadd.xlane.f32.xlu1 %v2123_v24  ;;  %v4861_v39 = vpop.eup %4860  ;;  %v2122_v2 = vmul.f32 %v4859_v29, %v5981_v10 }
 0x1c4   :  { %v1981_v6 = vpop.f32.mrb[17].mxu0  ;;  %v4677_v36 = vadd.f32 %v4676_v20, %v4430_v38  ;;  %v4863_v15 = vpop.eup %4862  ;;  %v2120_v58 = vmul.f32 %v4861_v39, %v5981_v10 }
 0x1c5   :  { %v4679_v49 = vadd.f32 %v4678_v35, %v1981_v6  ;;  %v4193_v37 = vpop.f32.mrb[18].mxu1  ;;  %v2125_v32 = vmul.f32 %v4863_v15, %v5981_v10  ;;  %v4865_v34 = vpop.eup %4864 }
 0x1c6   :  { %v4680_v41 = vadd.f32 %v4193_v37, %v5969_v5  ;;  %v1065_v62 = vpop.f32.mrb[19].mxu1  ;;  %v2124_v17 = vmul.f32 %v4865_v34, %v5981_v10 }
 0x1c7   :  { %v4433_v7 = vpop.f32.mrb[18].mxu0  ;;  %4868 = vtanh.f32 %v4679_v49  ;;  %v4682_v18 = vadd.f32 %v5969_v5, %v1065_v62  ;;  %2154 = vadd.xlane.f32.xlu0 %v2118_v48  ;;  %2162 = vadd.xlane.f32.xlu1 %v2122_v2 }
 0x1c8   :  { %v1993_v55 = vpop.f32.mrb[19].mxu0  ;;  %4870 = vtanh.f32 %v4671_v14  ;;  %v4681_v54 = vadd.f32 %v4680_v41, %v4433_v7  ;;  %v4867_v33 = vpop.eup %4866 }
 0x1c9   :  { %v4683_v46 = vadd.f32 %v4682_v18, %v1993_v55  ;;  %v4196_v26 = vpop.f32.mrb[20].mxu1  ;;  %v2127_v19 = vmul.f32 %v4867_v33, %v5981_v10 }
 0x1ca   :  { %4872 = vtanh.f32 %v4681_v54  ;;  %v4684_v51 = vadd.f32 %v4196_v26, %v5969_v5  ;;  %v1079_v9 = vpop.f32.mrb[21].mxu1 }
 0x1cb   :  { %v4436_v52 = vpop.f32.mrb[20].mxu0  ;;  %v4686_v60 = vadd.f32 %v5969_v5, %v1079_v9  ;;  %2158 = vadd.xlane.f32.xlu0 %v2120_v58  ;;  %2168 = vadd.xlane.f32.xlu1 %v2125_v32  ;;  %4874 = vtanh.f32 %v4675_v11 }
 0x1cc   :  { %v2005_v16 = vpop.f32.mrb[21].mxu0  ;;  %v4685_v0 = vadd.f32 %v4684_v51, %v4436_v52  ;;  %4876 = vtanh.f32 %v4683_v46 }
 0x1cd   :  { %v4687_v42 = vadd.f32 %v4686_v60, %v2005_v16  ;;  %v4199_v1 = vpop.f32.mrb[22].mxu1  ;;  %4878 = vtanh.f32 %v4677_v36 }
 0x1ce   :  { %v4688_v43 = vadd.f32 %v4199_v1, %v5969_v5  ;;  %v1093_v45 = vpop.f32.mrb[23].mxu1  ;;  %4880 = vtanh.f32 %v4685_v0 }
 0x1cf   :  { %v4439_v47 = vpop.f32.mrb[22].mxu0  ;;  %v4690_v40 = vadd.f32 %v5969_v5, %v1093_v45  ;;  %2166 = vadd.xlane.f32.xlu1 %v2124_v17 }
 0x1d0   :  { %v2017_v53 = vpop.f32.mrb[23].mxu0  ;;  %v4689_v61 = vadd.f32 %v4688_v43, %v4439_v47 }
 0x1d1   :  { %v4869_v31 = vpop.eup %4868  ;;  %v4691_v50 = vadd.f32 %v4690_v40, %v2017_v53  ;;  %v4202_v25 = vpop.f32.mrb[24].mxu1 }
 0x1d2   :  { %v4871_v14 = vpop.eup %4870  ;;  %4882 = vtanh.f32 %v4689_v61  ;;  %v4692_v27 = vadd.f32 %v4202_v25, %v5969_v5  ;;  %v1107_v23 = vpop.f32.mrb[25].mxu1  ;;  %v2130_v3 = vmul.f32 %v4869_v31, %v5981_v10 }
 0x1d3   :  { %v4442_v8 = vpop.f32.mrb[24].mxu0  ;;  %v4694_v56 = vadd.f32 %v5969_v5, %v1107_v23  ;;  %2172 = vadd.xlane.f32.xlu1 %v2127_v19  ;;  %4884 = vtanh.f32 %v4687_v42  ;;  %v2126_v11 = vmul.f32 %v4871_v14, %v5981_v10 }
 0x1d4   :  { %v2029_v12 = vpop.f32.mrb[25].mxu0  ;;  %v4873_v59 = vpop.eup %4872  ;;  %v4693_v22 = vadd.f32 %v4692_v27, %v4442_v8  ;;  %2178 = vadd.xlane.f32.xlu0 %v2130_v3 }
 0x1d5   :  { %v4695_v4 = vadd.f32 %v4694_v56, %v2029_v12  ;;  %v4205_v30 = vpop.f32.mrb[26].mxu1  ;;  %v2133_v28 = vmul.f32 %v4873_v59, %v5981_v10  ;;  %v4875_v38 = vpop.eup %4874 }
 0x1d6   :  { %4886 = vtanh.f32 %v4693_v22  ;;  %v4696_v63 = vadd.f32 %v4205_v30, %v5969_v5  ;;  %v1121_v24 = vpop.f32.mrb[27].mxu1  ;;  %v4877_v20 = vpop.eup %4876  ;;  %v2128_v49 = vmul.f32 %v4875_v38, %v5981_v10 }
 0x1d7   :  { %v4445_v44 = vpop.f32.mrb[26].mxu0  ;;  %v4698_v57 = vadd.f32 %v5969_v5, %v1121_v24  ;;  %2170 = vadd.xlane.f32.xlu1 %v2126_v11  ;;  %4888 = vtanh.f32 %v5998_v21  ;;  %v4879_v37 = vpop.eup %4878  ;;  %v2132_v15 = vmul.f32 %v4877_v20, %v5981_v10 }
 0x1d8   :  { %v2041_v29 = vpop.f32.mrb[27].mxu0  ;;  %v4697_v6 = vadd.f32 %v4696_v63, %v4445_v44  ;;  %2184 = vadd.xlane.f32.xlu0 %v2133_v28  ;;  %4890 = vtanh.f32 %v4691_v50  ;;  %v4881_v41 = vpop.eup %4880  ;;  %v2131_v26 = vmul.f32 %v4879_v37, %v5981_v10 }
 0x1d9   :  { %v4699_v35 = vadd.f32 %v4698_v57, %v2041_v29  ;;  %v4208_v36 = vpop.f32.mrb[28].mxu1  ;;  %v2135_v51 = vmul.f32 %v4881_v41, %v5981_v10  ;;  %v2242_v29 = vlaneseq }
 0x1da   :  { %v4700_v7 = vadd.f32 %v4208_v36, %v5969_v5  ;;  %v1135_v48 = vpop.f32.mrb[29].mxu1  ;;  %4892 = vtanh.f32 %v4697_v6 }
 0x1db   :  { %v4448_v39 = vpop.f32.mrb[28].mxu0  ;;  %v4702_v62 = vadd.f32 %v5969_v5, %v1135_v48  ;;  %2174 = vadd.xlane.f32.xlu1 %v2128_v49  ;;  %4894 = vtanh.f32 %v4695_v4  ;;  %v2243_v6 = vand.u32 127, %v2242_v29 }
 0x1dc   :  { %v2053_v2 = vpop.f32.mrb[29].mxu0  ;;  %v4883_v21 = vpop.eup %4882  ;;  %v4701_v55 = vadd.f32 %v4700_v7, %v4448_v39  ;;  %2182 = vadd.xlane.f32.xlu0 %v2132_v15 }
 0x1dd   :  { %v4703_v18 = vadd.f32 %v4702_v62, %v2053_v2  ;;  %v4211_v54 = vpop.f32.mrb[30].mxu1  ;;  %v2137_v52 = vmul.f32 %v4883_v21, %v5981_v10  ;;  %v4885_v9 = vpop.eup %4884 }
 0x1de   :  { %4896 = vtanh.f32 %v4701_v55  ;;  %v4704_v58 = vadd.f32 %v4211_v54, %v5969_v5  ;;  %v1149_v32 = vpop.f32.mrb[31].mxu1  ;;  %v2134_v17 = vmul.f32 %v4885_v9, %v5981_v10 }
 0x1df   :  { %v4451_v46 = vpop.f32.mrb[30].mxu0  ;;  %4898 = vtanh.f32 %v4703_v18  ;;  %v4706_v16 = vadd.f32 %v5969_v5, %v1149_v32  ;;  %2180 = vadd.xlane.f32.xlu1 %v2131_v26 }
 0x1e0   :  { %v2065_v34 = vpop.f32.mrb[31].mxu0  ;;  %v4887_v60 = vpop.eup %4886  ;;  %4900 = vtanh.f32 %v4699_v35  ;;  %v4705_v0 = vadd.f32 %v4704_v58, %v4451_v46  ;;  %2188 = vadd.xlane.f32.xlu0 %v2135_v51  ;;  %v6072_v35 = vshrl.u32 %v2242_v29, 7 }
 0x1e1   :  { %4902 = vtanh.f32 %v5984_v13  ;;  %v4707_v42 = vadd.f32 %v4706_v16, %v2065_v34  ;;  %v2139_v1 = vmul.f32 %v4887_v60, %v5981_v10  ;;  %v4889_v47 = vpop.eup %4888 }
 0x1e2   :  { %4904 = vtanh.f32 %v4705_v0  ;;  %v4891_v33 = vpop.eup %4890  ;;  %v2129_v5 = vmul.f32 %v4889_v47, %v5981_v10  ;;  %v6079_v49 = vsub.s32 %v2243_v6, %v6072_v35 }
 0x1e3   :  { %4906 = vtanh.f32 %v4707_v42  ;;  %2196 = vadd.xlane.f32.xlu1 %v2139_v1  ;;  %v2136_v45 = vmul.f32 %v4891_v33, %v5981_v10 }
 0x1e4   :  { %2186 = vadd.xlane.f32.xlu0 %v2134_v17  ;;  %v4893_v43 = vpop.eup %4892 }
 0x1e5   :  { %v4895_v53 = vpop.eup %4894  ;;  %v2141_v61 = vmul.f32 %v4893_v43, %v5981_v10 }
 0x1e6   :  { %v2138_v25 = vmul.f32 %v4895_v53, %v5981_v10 }
 0x1e7   :  { %2176 = vadd.xlane.f32.xlu1 %v2129_v5 }
 0x1e8   :  { %v4897_v40 = vpop.eup %4896  ;;  %2190 = vadd.xlane.f32.xlu0 %v2136_v45 }
 0x1e9   :  { %v4899_v13 = vpop.eup %4898  ;;  %v2143_v31 = vmul.f32 %v4897_v40, %v5981_v10 }
 0x1ea   :  { %v4901_v50 = vpop.eup %4900  ;;  %v2142_v8 = vmul.f32 %v4899_v13, %v5981_v10 }
 0x1eb   :  { %v4903_v19 = vpop.eup %4902  ;;  %2200 = vadd.xlane.f32.xlu1 %v2141_v61  ;;  %v2140_v23 = vmul.f32 %v4901_v50, %v5981_v10 }
 0x1ec   :  { %v4905_v14 = vpop.eup %4904  ;;  %2194 = vadd.xlane.f32.xlu0 %v2138_v25  ;;  %v2121_v3 = vmul.f32 %v4903_v19, %v5981_v10 }
 0x1ed   :  { %v4907_v27 = vpop.eup %4906  ;;  %v2145_v12 = vmul.f32 %v4905_v14, %v5981_v10 }
 0x1ee   :  { %v2144_v56 = vmul.f32 %v4907_v27, %v5981_v10 }
 0x1ef   :  { %2198 = vadd.xlane.f32.xlu1 %v2140_v23 }
 0x1f0   :  { %2160 = vadd.xlane.f32.xlu0 %v2121_v3 }
 0x1f3   :  { %2204 = vadd.xlane.f32.xlu1 %v2143_v31 }
 0x1f4   :  { %2192 = vadd.xlane.f32.xlu0 %v2137_v52 }
 0x1f7   :  { %2202 = vadd.xlane.f32.xlu1 %v2142_v8 }
 0x1fb   :  { %2206 = vadd.xlane.f32.xlu1 %v2144_v56 }
 0x1ff   :  { %2208 = vadd.xlane.f32.xlu1 %v2145_v12 }
 0x240   :  { %v6046_v59 = vpop.xlane.xlu0 %2148 }
 0x241   :  { %v2251_v16 = vrot.slane %v6046_v59, %v6079_v49 }
 0x244   :  { %v6048_v22 = vpop.xlane.xlu0 %2146 }
 0x245   :  { %v2247_v58 = vrot.slane %v6048_v22, %v6079_v49 }
 0x247   :  { %v2373_v17 = vsel %vm2372_vm0, %v2251_v16, %v2247_v58 }
 0x248   :  { %v6050_v4 = vpop.xlane.xlu0 %2152 }
 0x249   :  { %v2259_v40 = vrot.slane %v6050_v4, %v6079_v49 }
 0x24c   :  { %v6052_v30 = vpop.xlane.xlu0 %2150 }
 0x24d   :  { %v2255_v51 = vrot.slane %v6052_v30, %v6079_v49 }
 0x24f   :  { %v2375_v43 = vsel %vm2374_vm1, %v2255_v51, %v2373_v17 }
 0x250   :  { %v6054_v44 = vpop.xlane.xlu1 %2164  ;;  %v6056_v11 = vpop.xlane.xlu0 %2156  ;;  %v2377_v8 = vsel %vm2376_vm2, %v2259_v40, %v2375_v43 }
 0x251   :  { %v2283_v15 = vrot.slane %v6054_v44, %v6079_v49  ;;  %v2267_v12 = vrot.slane %v6056_v11, %v6079_v49 }
 0x254   :  { %v6058_v10 = vpop.xlane.xlu1 %2162  ;;  %v6060_v28 = vpop.xlane.xlu0 %2154 }
 0x255   :  { %v2279_v7 = vrot.slane %v6058_v10, %v6079_v49  ;;  %v2263_v45 = vrot.slane %v6060_v28, %v6079_v49 }
 0x257   :  { %v2386_v62 = vsel %vm2372_vm0, %v2283_v15, %v2279_v7  ;;  %v2379_v19 = vsel %vm2378_vm3, %v2263_v45, %v2377_v8 }
 0x258   :  { %v6062_v38 = vpop.xlane.xlu1 %2168  ;;  %v6066_v24 = vpop.xlane.xlu0 %2158 }
 0x259   :  { %v2291_v54 = vrot.slane %v6062_v38, %v6079_v49  ;;  %v2271_v14 = vrot.slane %v6066_v24, %v6079_v49 }
 0x25c   :  { %v6064_v63 = vpop.xlane.xlu1 %2166 }
 0x25d   :  { %v2287_v2 = vrot.slane %v6064_v63, %v6079_v49 }
 0x25f   :  { %v2387_v55 = vsel %vm2374_vm1, %v2287_v2, %v2386_v62  ;;  %v2381_v2 = vsel %vm2380_vm4, %v2267_v12, %v2379_v19 }
 0x260   :  { %v6068_v20 = vpop.xlane.xlu1 %2172  ;;  %v2388_v26 = vsel %vm2376_vm2, %v2291_v54, %v2387_v55  ;;  %v2383_v55 = vsel %vm2382_vm6, %v2271_v14, %v2381_v2 }
 0x261   :  { %v6070_v57 = vpop.xlane.xlu0 %2178  ;;  %v2299_v9 = vrot.slane %v6068_v20, %v6079_v49 }
 0x262   :  { %v2311_v33 = vrot.slane %v6070_v57, %v6079_v49 }
 0x264   :  { %v6074_v36 = vpop.xlane.xlu1 %2170 }
 0x265   :  { %v6076_v39 = vpop.xlane.xlu0 %2184  ;;  %v2295_v18 = vrot.slane %v6074_v36, %v6079_v49 }
 0x266   :  { %v2323_v3 = vrot.slane %v6076_v39, %v6079_v49 }
 0x267   :  { %v2389_v32 = vsel %vm2378_vm3, %v2295_v18, %v2388_v26 }
 0x268   :  { %v6081_v37 = vpop.xlane.xlu1 %2174  ;;  %v2390_v47 = vsel %vm2380_vm4, %v2299_v9, %v2389_v32 }
 0x269   :  { %v6085_v48 = vpop.xlane.xlu0 %2182  ;;  %v2303_v34 = vrot.slane %v6081_v37, %v6079_v49 }
 0x26a   :  { %v2319_v50 = vrot.slane %v6085_v48, %v6079_v49 }
 0x26b   :  { %v2391_v5 = vsel %vm2382_vm6, %v2303_v34, %v2390_v47 }
 0x26c   :  { %v6091_v41 = vpop.xlane.xlu1 %2180 }
 0x26d   :  { %v6094_v21 = vpop.xlane.xlu0 %2188  ;;  %v2315_v60 = vrot.slane %v6091_v41, %v6079_v49 }
 0x26e   :  { %v2331_v18 = vrot.slane %v6094_v21, %v6079_v49 }
 0x26f   :  { %v2393_v13 = vsel %vm2372_vm0, %v2315_v60, %v2311_v33 }
 0x270   :  { %v6101_v46 = vpop.xlane.xlu1 %2196  ;;  %v2394_v27 = vsel %vm2374_vm1, %v2319_v50, %v2393_v13 }
 0x271   :  { %v6104_v52 = vpop.xlane.xlu0 %2186  ;;  %v2395_v6 = vsel %vm2376_vm2, %v2323_v3, %v2394_v27  ;;  %v2347_v60 = vrot.slane %v6101_v46, %v6079_v49 }
 0x272   :  { %v2327_v23 = vrot.slane %v6104_v52, %v6079_v49 }
 0x274   :  { %v6119_v0 = vpop.xlane.xlu1 %2176  ;;  %v2396_v15 = vsel %vm2378_vm3, %v2327_v23, %v2395_v6  ;;  %v5144_v6 = vmov 0  }
 0x275   :  { %v2307_v42 = vrot.slane %v6119_v0, %v6079_v49  ;;  %v6123_v1 = vpop.xlane.xlu0 %2190  ;;  %v2397_v16 = vsel %vm2380_vm4, %v2331_v18, %v2396_v15  ;;  %4843 = vset.pattern.permute.xlu1 %v5144_v6  ;;  %4842 = vset.pattern.permute.xlu0 %v5144_v6  ;;  %v6217_v15 = vsub.s32 0, %v6072_v35 }
 0x276   :  { %v2335_v62 = vrot.slane %v6123_v1, %v6079_v49 }
 0x277   :  { %v2392_v53 = vsel %vm2384_vm5, %v2307_v42, %v2391_v5 }
 0x278   :  { %v6137_v61 = vpop.xlane.xlu1 %2200  ;;  %v2415_v31 = vsel %vm2411_vm7, %v2392_v53, -inf  ;;  %v2398_v42 = vsel %vm2382_vm6, %v2335_v62, %v2397_v16  ;;  %v6220_v62 = vsub.s32 2, %v6072_v35  ;;  %v6237_v16 = vsub.s32 5, %v6072_v35 }
 0x279   :  { %v6142_v25 = vpop.xlane.xlu0 %2194  ;;  %2416 = vmax.xlane.f32.xlu1 %v2415_v31  ;;  %v2355_v53 = vrot.slane %v6137_v61, %v6079_v49 }
 0x27a   :  { %v2343_v58 = vrot.slane %v6142_v25, %v6079_v49 }
 0x27c   :  { %v6155_v56 = vpop.xlane.xlu1 %2198  ;;  %v2400_v33 = vsel %vm2372_vm0, %v2347_v60, %v2343_v58 }
 0x27d   :  { %v6157_v29 = vpop.xlane.xlu0 %2160  ;;  %v2351_v51 = vrot.slane %v6155_v56, %v6079_v49 }
 0x27e   :  { %v2275_v7 = vrot.slane %v6157_v29, %v6079_v49 }
 0x27f   :  { %v2401_v43 = vsel %vm2374_vm1, %v2351_v51, %v2400_v33 }
 0x280   :  { %v6169_v54 = vpop.xlane.xlu1 %2204  ;;  %v2385_v26 = vsel %vm2384_vm5, %v2275_v7, %v2383_v55  ;;  %v2402_v13 = vsel %vm2376_vm2, %v2355_v53, %v2401_v43  ;;  %v6212_v7 = vsub.s32 1, %v6072_v35  ;;  %v6223_v55 = vsub.s32 3, %v6072_v35 }
 0x281   :  { %v6174_v32 = vpop.xlane.xlu0 %2192  ;;  %v2412_v34 = vsel %vm2411_vm7, %v2385_v26, -inf  ;;  %v2363_v8 = vrot.slane %v6169_v54, %v6079_v49  ;;  %v6247_v53 = vsub.s32 4, %v6072_v35 }
 0x282   :  { %v2339_v9 = vrot.slane %v6174_v32, %v6079_v49  ;;  %2413 = vmax.xlane.f32.xlu0 %v2412_v34 }
 0x284   :  { %v6185_v47 = vpop.xlane.xlu1 %2202  ;;  %v2399_v17 = vsel %vm2384_vm5, %v2339_v9, %v2398_v42 }
 0x285   :  { %v2418_v5 = vsel %vm2411_vm7, %v2399_v17, -inf  ;;  %v2359_v45 = vrot.slane %v6185_v47, %v6079_v49 }
 0x286   :  { %2419 = vmax.xlane.f32.xlu0 %v2418_v5 }
 0x287   :  { %v2403_v31 = vsel %vm2378_vm3, %v2359_v45, %v2402_v13 }
 0x288   :  { %v6195_v40 = vpop.xlane.xlu1 %2206  ;;  %v2404_v27 = vsel %vm2380_vm4, %v2363_v8, %v2403_v31 }
 0x289   :  { %v2367_v50 = vrot.slane %v6195_v40, %v6079_v49 }
 0x28b   :  { %v2405_v23 = vsel %vm2382_vm6, %v2367_v50, %v2404_v27 }
 0x28c   :  { %v6203_v19 = vpop.xlane.xlu1 %2208 }
 0x28d   :  { %v2371_v14 = vrot.slane %v6203_v19, %v6079_v49 }
 0x28f   :  { %v2406_v12 = vsel %vm2384_vm5, %v2371_v14, %v2405_v23 }
 0x290   :  { %v2421_v3 = vsel %vm2411_vm7, %v2406_v12, -inf }
 0x291   :  { %2422 = vmax.xlane.f32.xlu1 %v2421_v3 }
 0x306   :  { %v6214_v2 = vpop.xlane.xlu1 %2416 }
 0x307   :  { %v2467_v18 = vrot.slane %v6214_v2, %v6212_v7  ;;  %v2475_v60 = vrot.slane %v6214_v2, %v6223_v55  ;;  %v2483_v13 = vrot.slane %v6214_v2, %v6237_v16 }
 0x309   :  { %v2597_v42 = vsub.f32 %v6054_v44, %v2467_v18  ;;  %v2599_v44 = vsub.f32 %v6062_v38, %v2475_v60  ;;  %v2601_v14 = vsub.f32 %v6068_v20, %v2483_v13 }
 0x30b   :  { %v2638_v31 = vmul.f32 1.442695, %v2597_v42  ;;  %v2642_v27 = vmul.f32 1.442695, %v2599_v44  ;;  %v2646_v18 = vmul.f32 1.442695, %v2601_v14 }
 0x30f   :  { %v6227_v26 = vpop.xlane.xlu0 %2413 }
 0x310   :  { %v2431_v58 = vrot.slane %v6227_v26, %v6217_v15  ;;  %v2435_v34 = vrot.slane %v6227_v26, %v6212_v7  ;;  %v2439_v51 = vrot.slane %v6227_v26, %v6220_v62  ;;  %v2443_v33 = vrot.slane %v6227_v26, %v6223_v55 }
 0x311   :  { %v2451_v23 = vrot.slane %v6227_v26, %v6237_v16 }
 0x312   :  { %v2588_v9 = vsub.f32 %v6048_v22, %v2431_v58  ;;  %v2589_v17 = vsub.f32 %v6046_v59, %v2435_v34  ;;  %v2590_v5 = vsub.f32 %v6052_v30, %v2439_v51  ;;  %v6250_v22 = vsub.s32 7, %v6072_v35 }
 0x313   :  { %v2447_v59 = vrot.slane %v6227_v26, %v6247_v53  ;;  %v2591_v30 = vsub.f32 %v6050_v4, %v2443_v33  ;;  %v6264_v3 = vpop.xlane.xlu0 %2419  ;;  %v6267_v4 = vsub.s32 6, %v6072_v35  ;;  %v2593_v34 = vsub.f32 %v6056_v11, %v2451_v23 }
 0x314   :  { %v2620_v43 = vmul.f32 1.442695, %v2588_v9  ;;  %v2622_v45 = vmul.f32 1.442695, %v2589_v17  ;;  %v2624_v50 = vmul.f32 1.442695, %v2590_v5  ;;  %v2491_v8 = vrot.slane %v6214_v2, %v6250_v22 }
 0x315   :  { %v2592_v38 = vsub.f32 %v6060_v28, %v2447_v59  ;;  %v2626_v12 = vmul.f32 1.442695, %v2591_v30  ;;  %v2499_v20 = vrot.slane %v6264_v3, %v6212_v7  ;;  %v2455_v58 = vrot.slane %v6227_v26, %v6267_v4 }
 0x316   :  { %4908 = vpow2.f32 %v2620_v43  ;;  %v2603_v6 = vsub.f32 %v6119_v0, %v2491_v8  ;;  %v2511_v0 = vrot.slane %v6264_v3, %v6247_v53  ;;  %v2459_v11 = vrot.slane %v6227_v26, %v6250_v22 }
 0x317   :  { %4910 = vpow2.f32 %v2622_v45  ;;  %v2628_v28 = vmul.f32 1.442695, %v2592_v38  ;;  %v2605_v60 = vsub.f32 %v6091_v41, %v2499_v20  ;;  %v2594_v42 = vsub.f32 %v6066_v24, %v2455_v58 }
 0x318   :  { %4912 = vpow2.f32 %v2638_v31  ;;  %v2650_v35 = vmul.f32 1.442695, %v2603_v6  ;;  %v2630_v17 = vmul.f32 1.442695, %v2593_v34  ;;  %v2519_v43 = vrot.slane %v6264_v3, %v6267_v4 }
 0x319   :  { %4914 = vpow2.f32 %v2624_v50  ;;  %v2608_v41 = vsub.f32 %v6104_v52, %v2511_v0  ;;  %v2654_v45 = vmul.f32 1.442695, %v2605_v60  ;;  %v2463_v24 = vrot.slane %v6214_v2, %v6217_v15 }
 0x31a   :  { %4916 = vpow2.f32 %v2642_v27  ;;  %v2595_v26 = vsub.f32 %v6157_v29, %v2459_v11  ;;  %v2632_v13 = vmul.f32 1.442695, %v2594_v42  ;;  %v2610_v52 = vsub.f32 %v6123_v1, %v2519_v43 }
 0x31b   :  { %4918 = vpow2.f32 %v2626_v12  ;;  %v2660_v30 = vmul.f32 1.442695, %v2608_v41  ;;  %v2471_v29 = vrot.slane %v6214_v2, %v6220_v62  ;;  %v2596_v8 = vsub.f32 %v6058_v10, %v2463_v24 }
 0x31c   :  { %4920 = vpow2.f32 %v2646_v18  ;;  %v2634_v14 = vmul.f32 1.442695, %v2595_v26  ;;  %v2664_v1 = vmul.f32 1.442695, %v2610_v52  ;;  %v2479_v10 = vrot.slane %v6214_v2, %v6247_v53 }
 0x31d   :  { %4922 = vpow2.f32 %v2628_v28  ;;  %v2598_v6 = vsub.f32 %v6064_v63, %v2471_v29  ;;  %v2636_v18 = vmul.f32 1.442695, %v2596_v8  ;;  %v2487_v63 = vrot.slane %v6214_v2, %v6267_v4 }
 0x31e   :  { %4924 = vpow2.f32 %v2650_v35  ;;  %v6299_v44 = vpop.xlane.xlu1 %2422  ;;  %v2600_v35 = vsub.f32 %v6074_v36, %v2479_v10  ;;  %v2495_v43 = vrot.slane %v6264_v3, %v6217_v15  ;;  %v2507_v8 = vrot.slane %v6264_v3, %v6223_v55 }
 0x31f   :  { %4926 = vpow2.f32 %v2630_v17  ;;  %v2531_v50 = vrot.slane %v6299_v44, %v6212_v7  ;;  %v2535_v38 = vrot.slane %v6299_v44, %v6220_v62  ;;  %v2539_v34 = vrot.slane %v6299_v44, %v6223_v55 }
 0x320   :  { %v6275_v51 = vpop.eup %4908  ;;  %4928 = vpow2.f32 %v2654_v45  ;;  %v2640_v0 = vmul.f32 1.442695, %v2598_v6  ;;  %v2547_v42 = vrot.slane %v6299_v44, %v6237_v16  ;;  %v2602_v2 = vsub.f32 %v6081_v37, %v2487_v63 }
 0x321   :  { %v6277_v9 = vpop.eup %4910  ;;  %2717 = vperm.xlu0 %4842, %v6275_v51   ;;  %4930 = vpow2.f32 %v2632_v13  ;;  %v2613_v12 = vsub.f32 %v6101_v46, %v2531_v50  ;;  %v2614_v46 = vsub.f32 %v6155_v56, %v2535_v38  ;;  %v2615_v56 = vsub.f32 %v6137_v61, %v2539_v34 }
 0x322   :  { %2720 = vperm.xlu1 %4843, %v6277_v9   ;;  %v6287_v33 = vpop.eup %4912  ;;  %4932 = vpow2.f32 %v2660_v30  ;;  %v2644_v36 = vmul.f32 1.442695, %v2600_v35  ;;  %v2555_v61 = vrot.slane %v6299_v44, %v6250_v22  ;;  %v2617_v24 = vsub.f32 %v6169_v54, %v2547_v42 }
 0x323   :  { %v6289_v5 = vpop.eup %4914  ;;  %4934 = vpow2.f32 %v2634_v14  ;;  %v2670_v28 = vmul.f32 1.442695, %v2613_v12  ;;  %v2672_v17 = vmul.f32 1.442695, %v2614_v46  ;;  %v2674_v26 = vmul.f32 1.442695, %v2615_v56 }
 0x324   :  { %v6301_v31 = vpop.eup %4916  ;;  %4936 = vpow2.f32 %v2664_v1  ;;  %v2648_v37 = vmul.f32 1.442695, %v2602_v2  ;;  %v2503_v13 = vrot.slane %v6264_v3, %v6220_v62  ;;  %v2604_v52 = vsub.f32 %v6070_v57, %v2495_v43 }
 0x325   :  { %2744 = vperm.xlu0 %4842, %v6287_v33   ;;  %v6303_v59 = vpop.eup %4918  ;;  %4938 = vpow2.f32 %v2636_v18  ;;  %v2619_v29 = vsub.f32 %v6203_v19, %v2555_v61  ;;  %v2678_v54 = vmul.f32 1.442695, %v2617_v24  ;;  %v2515_v19 = vrot.slane %v6264_v3, %v6237_v16 }
 0x326   :  { %2723 = vperm.xlu1 %4843, %v6289_v5   ;;  %v6313_v27 = vpop.eup %4920  ;;  %4940 = vpow2.f32 %v2670_v28  ;;  %v2606_v14 = vsub.f32 %v6085_v48, %v2503_v13  ;;  %v2652_v1 = vmul.f32 1.442695, %v2604_v52  ;;  %v2607_v10 = vsub.f32 %v6076_v39, %v2507_v8 }
 0x327   :  { %v6315_v23 = vpop.eup %4922  ;;  %4942 = vpow2.f32 %v2640_v0  ;;  %v2682_v12 = vmul.f32 1.442695, %v2619_v29  ;;  %v2609_v34 = vsub.f32 %v6094_v21, %v2515_v19  ;;  %v2527_v28 = vrot.slane %v6299_v44, %v6217_v15 }
 0x328   :  { %v6325_v20 = vpop.eup %4924  ;;  %4944 = vpow2.f32 %v2672_v17  ;;  %v2656_v6 = vmul.f32 1.442695, %v2606_v14  ;;  %v2658_v46 = vmul.f32 1.442695, %v2607_v10  ;;  %v2543_v0 = vrot.slane %v6299_v44, %v6247_v53 }
 0x329   :  { %2750 = vperm.xlu0 %4842, %v6301_v31   ;;  %v6327_v58 = vpop.eup %4926  ;;  %4946 = vpow2.f32 %v2644_v36  ;;  %v2662_v35 = vmul.f32 1.442695, %v2609_v34  ;;  %v2612_v21 = vsub.f32 %v6142_v25, %v2527_v28  ;;  %v2551_v17 = vrot.slane %v6299_v44, %v6267_v4 }
 0x32a   :  { %2726 = vperm.xlu1 %4843, %v6303_v59   ;;  %v6337_v60 = vpop.eup %4928  ;;  %4948 = vpow2.f32 %v2674_v26  ;;  %v2616_v2 = vsub.f32 %v6185_v47, %v2543_v0  ;;  %v2523_v25 = vrot.slane %v6264_v3, %v6250_v22 }
 0x32b   :  { %v6339_v11 = vpop.eup %4930  ;;  %4950 = vpow2.f32 %v2648_v37  ;;  %v2668_v36 = vmul.f32 1.442695, %v2612_v21  ;;  %v2618_v24 = vsub.f32 %v6195_v40, %v2551_v17 }
 0x32c   :  { %v6349_v41 = vpop.eup %4932  ;;  %4952 = vpow2.f32 %v2678_v54  ;;  %v2676_v26 = vmul.f32 1.442695, %v2616_v2  ;;  %v2611_v47 = vsub.f32 %v6174_v32, %v2523_v25 }
 0x32d   :  { %2756 = vperm.xlu0 %4842, %v6313_v27   ;;  %v6351_v45 = vpop.eup %4934  ;;  %4954 = vpow2.f32 %v2652_v1  ;;  %v2680_v44 = vmul.f32 1.442695, %v2618_v24 }
 0x32e   :  { %2729 = vperm.xlu1 %4843, %v6315_v23   ;;  %v6361_v30 = vpop.eup %4936  ;;  %4956 = vpow2.f32 %v2682_v12  ;;  %v2666_v52 = vmul.f32 1.442695, %v2611_v47 }
 0x32f   :  { %v6363_v50 = vpop.eup %4938  ;;  %4958 = vpow2.f32 %v2656_v6 }
 0x330   :  { %v6371_v57 = vpop.eup %4940  ;;  %4960 = vpow2.f32 %v2658_v46 }
 0x331   :  { %2762 = vperm.xlu0 %4842, %v6325_v20   ;;  %v6373_v38 = vpop.eup %4942  ;;  %4962 = vpow2.f32 %v2662_v35 }
 0x332   :  { %2732 = vperm.xlu1 %4843, %v6327_v58   ;;  %v6380_v18 = vpop.eup %4944  ;;  %4964 = vpow2.f32 %v2668_v36 }
 0x333   :  { %v6382_v48 = vpop.eup %4946  ;;  %4966 = vpow2.f32 %v2676_v26 }
 0x334   :  { %v6389_v63 = vpop.eup %4948  ;;  %4968 = vpow2.f32 %v2680_v44 }
 0x335   :  { %2768 = vperm.xlu0 %4842, %v6337_v60   ;;  %v6391_v39 = vpop.eup %4950  ;;  %4970 = vpow2.f32 %v2666_v52 }
 0x336   :  { %2735 = vperm.xlu1 %4843, %v6339_v11   ;;  %v6398_v42 = vpop.eup %4952 }
 0x337   :  { %v6400_v56 = vpop.eup %4954 }
 0x338   :  { %v6407_v43 = vpop.eup %4956 }
 0x339   :  { %2777 = vperm.xlu0 %4842, %v6349_v41   ;;  %v6409_v61 = vpop.eup %4958 }
 0x33a   :  { %2738 = vperm.xlu1 %4843, %v6351_v45   ;;  %v6416_v37 = vpop.eup %4960 }
 0x33b   :  { %v6420_v13 = vpop.eup %4962 }
 0x33c   :  { %v6423_v29 = vpop.eup %4964 }
 0x33d   :  { %2783 = vperm.xlu0 %4842, %v6361_v30   ;;  %v6426_v40 = vpop.eup %4966 }
 0x33e   :  { %2741 = vperm.xlu1 %4843, %v6363_v50   ;;  %v6429_v3 = vpop.eup %4968 }
 0x33f   :  { %v6432_v32 = vpop.eup %4970 }
 0x341   :  { %2792 = vperm.xlu0 %4842, %v6371_v57  }
 0x342   :  { %2747 = vperm.xlu1 %4843, %v6373_v38  }
 0x345   :  { %2795 = vperm.xlu0 %4842, %v6380_v18  }
 0x346   :  { %2753 = vperm.xlu1 %4843, %v6382_v48  }
 0x349   :  { %2798 = vperm.xlu0 %4842, %v6389_v63  }
 0x34a   :  { %2759 = vperm.xlu1 %4843, %v6391_v39  }
 0x34d   :  { %2804 = vperm.xlu0 %4842, %v6398_v42  }
 0x34e   :  { %2765 = vperm.xlu1 %4843, %v6400_v56  }
 0x351   :  { %2810 = vperm.xlu0 %4842, %v6407_v43  }
 0x352   :  { %2771 = vperm.xlu1 %4843, %v6409_v61  }
 0x356   :  { %2774 = vperm.xlu1 %4843, %v6416_v37  }
 0x35a   :  { %2780 = vperm.xlu1 %4843, %v6420_v13  }
 0x35e   :  { %2789 = vperm.xlu1 %4843, %v6423_v29  }
 0x362   :  { %2801 = vperm.xlu1 %4843, %v6426_v40  }
 0x366   :  { %2807 = vperm.xlu1 %4843, %v6429_v3  }
 0x36a   :  { %2786 = vperm.xlu1 %4843, %v6432_v32  }
 0x3a0   :  { %v2718_v54 = vpop.permute.xlu0 %2717 }
 0x3a1   :  { %v2721_v8 = vpop.permute.xlu1 %2720  ;;  %v2815_v46 = vrot.slane %v2718_v54, %v6079_v49 }
 0x3a2   :  { %v2819_v28 = vrot.slane %v2721_v8, %v6079_v49 }
 0x3a4   :  { %v2745_v14 = vpop.permute.xlu0 %2744  ;;  %v2940_v36 = vsel %vm2372_vm0, %v2819_v28, %v2815_v46 }
 0x3a5   :  { %v2724_v1 = vpop.permute.xlu1 %2723 }
 0x3a6   :  { %v2823_v35 = vrot.slane %v2724_v1, %v6079_v49 }
 0x3a8   :  { %v2751_v12 = vpop.permute.xlu0 %2750  ;;  %v2941_v24 = vsel %vm2374_vm1, %v2823_v35, %v2940_v36 }
 0x3a9   :  { %v2727_v19 = vpop.permute.xlu1 %2726 }
 0x3aa   :  { %v2827_v0 = vrot.slane %v2727_v19, %v6079_v49 }
 0x3ac   :  { %v2757_v6 = vpop.permute.xlu0 %2756  ;;  %v2942_v47 = vsel %vm2376_vm2, %v2827_v0, %v2941_v24  ;;  %v2851_v0 = vrot.slane %v2745_v14, %v6079_v49  ;;  %v2859_v24 = vrot.slane %v2751_v12, %v6079_v49 }
 0x3ad   :  { %v2730_v10 = vpop.permute.xlu1 %2729 }
 0x3ae   :  { %v2831_v17 = vrot.slane %v2730_v10, %v6079_v49 }
 0x3b0   :  { %v2763_v21 = vpop.permute.xlu0 %2762  ;;  %v2943_v44 = vsel %vm2378_vm3, %v2831_v17, %v2942_v47 }
 0x3b1   :  { %v2733_v34 = vpop.permute.xlu1 %2732 }
 0x3b2   :  { %v2835_v25 = vrot.slane %v2733_v34, %v6079_v49 }
 0x3b4   :  { %v2944_v54 = vsel %vm2380_vm4, %v2835_v25, %v2943_v44  ;;  %v2769_v8 = vpop.permute.xlu0 %2768 }
 0x3b5   :  { %v2736_v2 = vpop.permute.xlu1 %2735 }
 0x3b6   :  { %v2839_v26 = vrot.slane %v2736_v2, %v6079_v49 }
 0x3b8   :  { %v2945_v19 = vsel %vm2382_vm6, %v2839_v26, %v2944_v54  ;;  %v2778_v35 = vpop.permute.xlu0 %2777 }
 0x3b9   :  { %v2739_v52 = vpop.permute.xlu1 %2738 }
 0x3ba   :  { %v2843_v1 = vrot.slane %v2739_v52, %v6079_v49 }
 0x3bc   :  { %v2946_v10 = vsel %vm2384_vm5, %v2843_v1, %v2945_v19  ;;  %v2784_v47 = vpop.permute.xlu0 %2783  ;;  %v2867_v1 = vrot.slane %v2757_v6, %v6079_v49 }
 0x3bd   :  { %v2742_v46 = vpop.permute.xlu1 %2741  ;;  %v2972_v34 = vsel %vm2411_vm7, %v2946_v10, 0.0  ;;  %v2875_v10 = vrot.slane %v2763_v21, %v6079_v49 }
 0x3be   :  { %2973 = vadd.xlane.f32.xlu1 %v2972_v34  ;;  %v2847_v28 = vrot.slane %v2742_v46, %v6079_v49 }
 0x3c0   :  { %v2947_v36 = vsel %vm2372_vm0, %v2851_v0, %v2847_v28  ;;  %v2793_v34 = vpop.permute.xlu0 %2792 }
 0x3c1   :  { %v2748_v17 = vpop.permute.xlu1 %2747 }
 0x3c2   :  { %v2855_v2 = vrot.slane %v2748_v17, %v6079_v49 }
 0x3c4   :  { %v2948_v25 = vsel %vm2374_vm1, %v2855_v2, %v2947_v36  ;;  %v2796_v36 = vpop.permute.xlu0 %2795 }
 0x3c5   :  { %v2754_v26 = vpop.permute.xlu1 %2753  ;;  %v2949_v52 = vsel %vm2376_vm2, %v2859_v24, %v2948_v25 }
 0x3c6   :  { %v2863_v44 = vrot.slane %v2754_v26, %v6079_v49 }
 0x3c8   :  { %v2950_v54 = vsel %vm2378_vm3, %v2863_v44, %v2949_v52  ;;  %v2799_v6 = vpop.permute.xlu0 %2798  ;;  %v2915_v44 = vrot.slane %v2793_v34, %v6079_v49 }
 0x3c9   :  { %v2760_v14 = vpop.permute.xlu1 %2759  ;;  %v2951_v46 = vsel %vm2380_vm4, %v2867_v1, %v2950_v54  ;;  %v2919_v1 = vrot.slane %v2796_v36, %v6079_v49 }
 0x3ca   :  { %v2871_v19 = vrot.slane %v2760_v14, %v6079_v49 }
 0x3cc   :  { %v2952_v12 = vsel %vm2382_vm6, %v2871_v19, %v2951_v46  ;;  %v2805_v21 = vpop.permute.xlu0 %2804  ;;  %v2883_v19 = vrot.slane %v2769_v8, %v6079_v49 }
 0x3cd   :  { %v2766_v28 = vpop.permute.xlu1 %2765  ;;  %v2953_v0 = vsel %vm2384_vm5, %v2875_v10, %v2952_v12  ;;  %v2923_v10 = vrot.slane %v2799_v6, %v6079_v49 }
 0x3ce   :  { %v2975_v17 = vsel %vm2411_vm7, %v2953_v0, 0.0  ;;  %v2879_v52 = vrot.slane %v2766_v28, %v6079_v49 }
 0x3cf   :  { %2976 = vadd.xlane.f32.xlu0 %v2975_v17 }
 0x3d0   :  { %v2954_v17 = vsel %vm2372_vm0, %v2883_v19, %v2879_v52 }
 0x3d1   :  { %v2772_v2 = vpop.permute.xlu1 %2771 }
 0x3d2   :  { %v2887_v14 = vrot.slane %v2772_v2, %v6079_v49  ;;  %v2811_v2 = vpop.permute.xlu0 %2810 }
 0x3d3   :  { %v2939_v19 = vrot.slane %v2811_v2, %v6079_v49 }
 0x3d4   :  { %v2955_v36 = vsel %vm2374_vm1, %v2887_v14, %v2954_v17 }
 0x3d5   :  { %v2775_v25 = vpop.permute.xlu1 %2774 }
 0x3d6   :  { %v2891_v46 = vrot.slane %v2775_v25, %v6079_v49 }
 0x3d8   :  { %v2956_v8 = vsel %vm2376_vm2, %v2891_v46, %v2955_v36 }
 0x3d9   :  { %v2781_v24 = vpop.permute.xlu1 %2780 }
 0x3da   :  { %v2899_v6 = vrot.slane %v2781_v24, %v6079_v49  ;;  %v2903_v24 = vrot.slane %v2784_v47, %v6079_v49 }
 0x3dd   :  { %v2790_v26 = vpop.permute.xlu1 %2789 }
 0x3de   :  { %v2911_v54 = vrot.slane %v2790_v26, %v6079_v49 }
 0x3e0   :  { %v2961_v12 = vsel %vm2372_vm0, %v2915_v44, %v2911_v54  ;;  %v2895_v44 = vrot.slane %v2778_v35, %v6079_v49  ;;  %v2931_v54 = vrot.slane %v2805_v21, %v6079_v49 }
 0x3e1   :  { %v2962_v0 = vsel %vm2374_vm1, %v2919_v1, %v2961_v12  ;;  %v2802_v34 = vpop.permute.xlu1 %2801 }
 0x3e2   :  { %v2963_v28 = vsel %vm2376_vm2, %v2923_v10, %v2962_v0  ;;  %v2927_v26 = vrot.slane %v2802_v34, %v6079_v49  ;;  %v2957_v10 = vsel %vm2378_vm3, %v2895_v44, %v2956_v8 }
 0x3e3   :  { %v2958_v12 = vsel %vm2380_vm4, %v2899_v6, %v2957_v10 }
 0x3e4   :  { %v2964_v25 = vsel %vm2378_vm3, %v2927_v26, %v2963_v28  ;;  %v2959_v17 = vsel %vm2382_vm6, %v2903_v24, %v2958_v12 }
 0x3e5   :  { %v2808_v1 = vpop.permute.xlu1 %2807  ;;  %v2965_v14 = vsel %vm2380_vm4, %v2931_v54, %v2964_v25 }
 0x3e6   :  { %v2935_v52 = vrot.slane %v2808_v1, %v6079_v49 }
 0x3e8   :  { %v2966_v46 = vsel %vm2382_vm6, %v2935_v52, %v2965_v14 }
 0x3e9   :  { %v2787_v0 = vpop.permute.xlu1 %2786  ;;  %v2967_v35 = vsel %vm2384_vm5, %v2939_v19, %v2966_v46 }
 0x3ea   :  { %v2907_v21 = vrot.slane %v2787_v0, %v6079_v49  ;;  %v2981_v34 = vsel %vm2411_vm7, %v2967_v35, 0.0 }
 0x3eb   :  { %2982 = vadd.xlane.f32.xlu1 %v2981_v34 }
 0x3ec   :  { %v2960_v28 = vsel %vm2384_vm5, %v2907_v21, %v2959_v17 }
 0x3ed   :  { %v2978_v26 = vsel %vm2411_vm7, %v2960_v28, 0.0 }
 0x3ee   :  { %2979 = vadd.xlane.f32.xlu0 %v2978_v26 }
 0x44b   :  { %v2974_v36 = vpop.xlane.xlu1 %2973 }
 0x44c   :  { %v2995_v2 = vrot.slane %v2974_v36, %v6212_v7  ;;  %v2991_v47 = vrot.slane %v2974_v36, %v6217_v15  ;;  %v2999_v8 = vrot.slane %v2974_v36, %v6220_v62  ;;  %v3003_v6 = vrot.slane %v2974_v36, %v6223_v55 }
 0x44d   :  { %v3007_v49 = vrot.slane %v2974_v36, %v6247_v53  ;;  %v3011_v25 = vrot.slane %v2974_v36, %v6237_v16  ;;  %v3015_v44 = vrot.slane %v2974_v36, %v6267_v4  ;;  %v3019_v54 = vrot.slane %v2974_v36, %v6250_v22 }
 0x44e   :  { %4972 = vrcp.f32 %v2995_v2 }
 0x44f   :  { %4974 = vrcp.f32 %v2991_v47 }
 0x450   :  { %4976 = vrcp.f32 %v2999_v8 }
 0x451   :  { %4978 = vrcp.f32 %v3003_v6 }
 0x452   :  { %4980 = vrcp.f32 %v3007_v49 }
 0x453   :  { %4982 = vrcp.f32 %v3011_v25 }
 0x454   :  { %4984 = vrcp.f32 %v3015_v44 }
 0x455   :  { %4986 = vrcp.f32 %v3019_v54 }
 0x458   :  { %v4973_v1 = vpop.eup %4972 }
 0x459   :  { %v4975_v52 = vpop.eup %4974  ;;  %v3151_v19 = vmul.f32 %v4973_v1, %v6277_v9 }
 0x45a   :  { %v4977_v10 = vpop.eup %4976  ;;  %v3149_v14 = vmul.f32 %v4975_v52, %v6275_v51 }
 0x45b   :  { %v4979_v12 = vpop.eup %4978  ;;  %3219 = vperm.xlu1 %4843, %v3151_v19   ;;  %v3153_v24 = vmul.f32 %v4977_v10, %v6289_v5 }
 0x45c   :  { %3214 = vperm.xlu0 %4842, %v3149_v14   ;;  %v2977_v46 = vpop.xlane.xlu0 %2976  ;;  %v4981_v34 = vpop.eup %4980  ;;  %v3155_v17 = vmul.f32 %v4979_v12, %v6303_v59 }
 0x45d   :  { %v3023_v0 = vrot.slane %v2977_v46, %v6217_v15  ;;  %v3027_v35 = vrot.slane %v2977_v46, %v6212_v7  ;;  %v3031_v21 = vrot.slane %v2977_v46, %v6220_v62  ;;  %v3035_v9 = vrot.slane %v2977_v46, %v6223_v55  ;;  %v4983_v28 = vpop.eup %4982 }
 0x45e   :  { %v3157_v51 = vmul.f32 %v4981_v34, %v6315_v23  ;;  %v3039_v5 = vrot.slane %v2977_v46, %v6247_v53  ;;  %v4985_v26 = vpop.eup %4984  ;;  %v3159_v36 = vmul.f32 %v4983_v28, %v6327_v58  ;;  %v3043_v2 = vrot.slane %v2977_v46, %v6237_v16 }
 0x45f   :  { %3224 = vperm.xlu1 %4843, %v3153_v24   ;;  %4988 = vrcp.f32 %v3023_v0  ;;  %v4987_v47 = vpop.eup %4986  ;;  %v3161_v59 = vmul.f32 %v4985_v26, %v6339_v11  ;;  %v3047_v8 = vrot.slane %v2977_v46, %v6267_v4  ;;  %v3051_v23 = vrot.slane %v2977_v46, %v6250_v22 }
 0x460   :  { %3229 = vperm.xlu0 %4842, %v3155_v17   ;;  %4990 = vrcp.f32 %v3027_v35  ;;  %v3163_v6 = vmul.f32 %v4987_v47, %v6351_v45 }
 0x461   :  { %4992 = vrcp.f32 %v3031_v21 }
 0x462   :  { %4994 = vrcp.f32 %v3035_v9 }
 0x463   :  { %3234 = vperm.xlu1 %4843, %v3157_v51   ;;  %4996 = vrcp.f32 %v3039_v5 }
 0x464   :  { %3239 = vperm.xlu0 %4842, %v3159_v36   ;;  %4998 = vrcp.f32 %v3043_v2 }
 0x465   :  { %5000 = vrcp.f32 %v3047_v8 }
 0x466   :  { %5002 = vrcp.f32 %v3051_v23 }
 0x467   :  { %3244 = vperm.xlu1 %4843, %v3161_v59  }
 0x468   :  { %3249 = vperm.xlu0 %4842, %v3163_v6  }
 0x469   :  { %v4989_v49 = vpop.eup %4988 }
 0x46a   :  { %v4991_v58 = vpop.eup %4990  ;;  %v3165_v25 = vmul.f32 %v4989_v49, %v6363_v50 }
 0x46b   :  { %v4993_v44 = vpop.eup %4992  ;;  %v3167_v54 = vmul.f32 %v4991_v58, %v6287_v33 }
 0x46c   :  { %v4995_v11 = vpop.eup %4994  ;;  %3254 = vperm.xlu1 %4843, %v3165_v25   ;;  %v3169_v1 = vmul.f32 %v4993_v44, %v6373_v38 }
 0x46d   :  { %3259 = vperm.xlu0 %4842, %v3167_v54   ;;  %v4997_v45 = vpop.eup %4996  ;;  %v3171_v52 = vmul.f32 %v4995_v11, %v6301_v31 }
 0x46e   :  { %v4999_v19 = vpop.eup %4998  ;;  %v3173_v10 = vmul.f32 %v4997_v45, %v6382_v48 }
 0x46f   :  { %v5001_v14 = vpop.eup %5000  ;;  %v3175_v50 = vmul.f32 %v4999_v19, %v6313_v27 }
 0x470   :  { %3264 = vperm.xlu1 %4843, %v3169_v1   ;;  %v5003_v12 = vpop.eup %5002  ;;  %v3177_v33 = vmul.f32 %v5001_v14, %v6391_v39 }
 0x471   :  { %3269 = vperm.xlu0 %4842, %v3171_v52   ;;  %v3179_v46 = vmul.f32 %v5003_v12, %v6325_v20 }
 0x474   :  { %3274 = vperm.xlu1 %4843, %v3173_v10   ;;  %v5037_v10 = vld [vmem:[#allocation2] sm:$0xff] }
 0x475   :  { %3279 = vperm.xlu0 %4842, %v3175_v50  }
 0x478   :  { %3284 = vperm.xlu1 %4843, %v3177_v33   ;;  %v2983_v35 = vpop.xlane.xlu1 %2982 }
 0x479   :  { %3289 = vperm.xlu0 %4842, %v3179_v46   ;;  %v3091_v39 = vrot.slane %v2983_v35, %v6212_v7  ;;  %v3095_v17 = vrot.slane %v2983_v35, %v6220_v62  ;;  %v3087_v51 = vrot.slane %v2983_v35, %v6217_v15  ;;  %v3107_v8 = vrot.slane %v2983_v35, %v6237_v16  ;;  %v5038_v46 = vld [vmem:[#allocation2 + $0x10] sm:$0xff] }
 0x47a   :  { %v3115_v23 = vrot.slane %v2983_v35, %v6250_v22 }
 0x47b   :  { %v2980_v38 = vpop.xlane.xlu0 %2979 }
 0x47c   :  { %v3059_v31 = vrot.slane %v2980_v38, %v6212_v7  ;;  %v3055_v24 = vrot.slane %v2980_v38, %v6217_v15  ;;  %v3067_v0 = vrot.slane %v2980_v38, %v6223_v55  ;;  %v3063_v48 = vrot.slane %v2980_v38, %v6220_v62 }
 0x47d   :  { %v3075_v27 = vrot.slane %v2980_v38, %v6237_v16  ;;  %v3071_v20 = vrot.slane %v2980_v38, %v6247_v53  ;;  %v3079_v21 = vrot.slane %v2980_v38, %v6267_v4  ;;  %v3103_v7 = vrot.slane %v2983_v35, %v6247_v53 }
 0x47e   :  { %5004 = vrcp.f32 %v3059_v31  ;;  %v3099_v62 = vrot.slane %v2983_v35, %v6223_v55  ;;  %v3111_v15 = vrot.slane %v2983_v35, %v6267_v4  ;;  %v3083_v55 = vrot.slane %v2980_v38, %v6250_v22 }
 0x47f   :  { %5006 = vrcp.f32 %v3055_v24  ;;  %v5039_v24 = vld [vmem:[#allocation2 + $0x18] sm:$0xff] }
 0x480   :  { %5008 = vrcp.f32 %v3067_v0 }
 0x481   :  { %5010 = vrcp.f32 %v3063_v48 }
 0x482   :  { %5012 = vrcp.f32 %v3075_v27 }
 0x483   :  { %5014 = vrcp.f32 %v3071_v20 }
 0x484   :  { %5016 = vrcp.f32 %v3091_v39 }
 0x485   :  { %5018 = vrcp.f32 %v3079_v21 }
 0x486   :  { %5020 = vrcp.f32 %v3095_v17 }
 0x487   :  { %5022 = vrcp.f32 %v3087_v51  ;;  %v5041_v51 = vld [vmem:[#allocation2 + $0x28] sm:$0xff] }
 0x488   :  { %v5005_v34 = vpop.eup %5004  ;;  %5024 = vrcp.f32 %v3103_v7 }
 0x489   :  { %v5007_v9 = vpop.eup %5006  ;;  %v3183_v28 = vmul.f32 %v5005_v34, %v6337_v60  ;;  %5026 = vrcp.f32 %v3099_v62  ;;  %v5040_v34 = vld [vmem:[#allocation2 + $0x20] sm:$0xff] }
 0x48a   :  { %v5009_v5 = vpop.eup %5008  ;;  %v3181_v26 = vmul.f32 %v5007_v9, %v6400_v56  ;;  %5028 = vrcp.f32 %v3111_v15 }
 0x48b   :  { %v5011_v36 = vpop.eup %5010  ;;  %3299 = vperm.xlu1 %4843, %v3183_v28   ;;  %v3187_v2 = vmul.f32 %v5009_v5, %v6416_v37  ;;  %5030 = vrcp.f32 %v3107_v8 }
 0x48c   :  { %3294 = vperm.xlu0 %4842, %v3181_v26   ;;  %v5013_v47 = vpop.eup %5012  ;;  %v3185_v60 = vmul.f32 %v5011_v36, %v6409_v61  ;;  %5032 = vrcp.f32 %v3083_v55 }
 0x48d   :  { %v5015_v59 = vpop.eup %5014  ;;  %v3191_v56 = vmul.f32 %v5013_v47, %v6420_v13  ;;  %5034 = vrcp.f32 %v3115_v23  ;;  %v5043_v23 = vld [vmem:[#allocation2 + $0x38] sm:$0xff] }
 0x48e   :  { %v5017_v53 = vpop.eup %5016  ;;  %v3189_v37 = vmul.f32 %v5015_v59, %v6349_v41 }
 0x48f   :  { %3309 = vperm.xlu1 %4843, %v3187_v2   ;;  %v5019_v6 = vpop.eup %5018  ;;  %v3199_v61 = vmul.f32 %v5017_v53, %v6371_v57  ;;  %v5042_v53 = vld [vmem:[#allocation2 + $0x30] sm:$0xff] }
 0x490   :  { %3304 = vperm.xlu0 %4842, %v3185_v60   ;;  %v5021_v4 = vpop.eup %5020  ;;  %v3193_v13 = vmul.f32 %v5019_v6, %v6361_v30 }
 0x491   :  { %v5023_v49 = vpop.eup %5022  ;;  %v3201_v16 = vmul.f32 %v5021_v4, %v6380_v18 }
 0x492   :  { %v5025_v41 = vpop.eup %5024  ;;  %v3197_v58 = vmul.f32 %v5023_v49, %v6423_v29 }
 0x493   :  { %3319 = vperm.xlu1 %4843, %v3191_v56   ;;  %v5027_v25 = vpop.eup %5026  ;;  %v3205_v57 = vmul.f32 %v5025_v41, %v6426_v40 }
 0x494   :  { %3314 = vperm.xlu0 %4842, %v3189_v37   ;;  %v5029_v44 = vpop.eup %5028  ;;  %v3203_v22 = vmul.f32 %v5027_v25, %v6389_v63  ;;  %v5036_v63 = vld [vmem:[#allocation2 + $0x8] sm:$0xff] }
 0x495   :  { %v5031_v54 = vpop.eup %5030  ;;  %v3209_v30 = vmul.f32 %v5029_v44, %v6429_v3 }
 0x496   :  { %v5033_v11 = vpop.eup %5032  ;;  %v3207_v18 = vmul.f32 %v5031_v54, %v6398_v42 }
 0x497   :  { %3339 = vperm.xlu1 %4843, %v3199_v61   ;;  %v5035_v1 = vpop.eup %5034  ;;  %v3195_v29 = vmul.f32 %v5033_v11, %v6432_v32 }
 0x498   :  { %3324 = vperm.xlu0 %4842, %v3193_v13   ;;  %v3211_v45 = vmul.f32 %v5035_v1, %v6407_v43 }
 0x49b   :  { %3344 = vperm.xlu1 %4843, %v3201_v16  }
 0x49c   :  { %3334 = vperm.xlu0 %4842, %v3197_v58  }
 0x49f   :  { %3354 = vperm.xlu1 %4843, %v3205_v57  }
 0x4a0   :  { %3349 = vperm.xlu0 %4842, %v3203_v22  }
 0x4a3   :  { %3364 = vperm.xlu1 %4843, %v3209_v30  }
 0x4a4   :  { %3359 = vperm.xlu0 %4842, %v3207_v18  }
 0x4a7   :  { %3329 = vperm.xlu1 %4843, %v3195_v29  }
 0x4a8   :  { %3369 = vperm.xlu0 %4842, %v3211_v45   ;;  %v5044_v45 = vld [vmem:[#allocation2 + $0x40] sm:$0xff] }
 0x4da   :  { %v3220_v40 = vpop.permute.xlu1 %3219 }
 0x4db   :  { %v3215_v52 = vpop.permute.xlu0 %3214  ;;  %v3373_v19 = vmul.f32 %v5036_v63, %v3220_v40 }
 0x4dc   :  { %v3372_v14 = vmul.f32 %v5037_v10, %v3215_v52  ;;  %v5045_v10 = vld [vmem:[#allocation2 + $0x48] sm:$0xff] }
 0x4dd   :  { %v3410_v50 = vrot.slane %v3373_v19, 4 }
 0x4de   :  { %v3404_v3 = vrot.slane %v3372_v14, 4  ;;  %v3225_v12 = vpop.permute.xlu1 %3224 }
 0x4df   :  { %v3411_v33 = vadd.f32 %v3410_v50, %v3373_v19  ;;  %v3230_v42 = vpop.permute.xlu0 %3229  ;;  %v3374_v38 = vmul.f32 %v5038_v46, %v3225_v12 }
 0x4e0   :  { %v3405_v31 = vadd.f32 %v3404_v3, %v3372_v14  ;;  %v3375_v32 = vmul.f32 %v5039_v24, %v3230_v42 }
 0x4e1   :  { %v3412_v0 = vrot.slane %v3411_v33, 2  ;;  %v3416_v43 = vrot.slane %v3374_v38, 4 }
 0x4e2   :  { %v3406_v48 = vrot.slane %v3405_v31, 2  ;;  %v3422_v27 = vrot.slane %v3375_v32, 4  ;;  %v3235_v35 = vpop.permute.xlu1 %3234 }
 0x4e3   :  { %v3413_v20 = vadd.f32 %v3412_v0, %v3411_v33  ;;  %v3417_v39 = vadd.f32 %v3416_v43, %v3374_v38  ;;  %v3240_v21 = vpop.permute.xlu0 %3239  ;;  %v3376_v17 = vmul.f32 %v5040_v34, %v3235_v35 }
 0x4e4   :  { %v3407_v9 = vadd.f32 %v3406_v48, %v3405_v31  ;;  %v3423_v28 = vadd.f32 %v3422_v27, %v3375_v32  ;;  %v3377_v5 = vmul.f32 %v5041_v51, %v3240_v21  ;;  %v5046_v48 = vld [vmem:[#allocation2 + $0x50] sm:$0xff]  ;;  %v5047_v21 = vld [vmem:[#allocation2 + $0x58] sm:$0xff] }
 0x4e5   :  { %v3414_v26 = vrot.slane %v3413_v20, 1  ;;  %v3418_v36 = vrot.slane %v3417_v39, 2  ;;  %v3428_v7 = vrot.slane %v3376_v17, 4 }
 0x4e6   :  { %v3408_v2 = vrot.slane %v3407_v9, 1  ;;  %v3424_v62 = vrot.slane %v3423_v28, 2  ;;  %v3434_v47 = vrot.slane %v3377_v5, 4  ;;  %v3245_v60 = vpop.permute.xlu1 %3244 }
 0x4e7   :  { %v3415_v59 = vadd.f32 %v3414_v26, %v3413_v20  ;;  %v3419_v15 = vadd.f32 %v3418_v36, %v3417_v39  ;;  %v3429_v56 = vadd.f32 %v3428_v7, %v3376_v17  ;;  %v3250_v8 = vpop.permute.xlu0 %3249  ;;  %v3378_v37 = vmul.f32 %v5042_v53, %v3245_v60 }
 0x4e8   :  { %v3409_v6 = vadd.f32 %v3408_v2, %v3407_v9  ;;  %v3425_v55 = vadd.f32 %v3424_v62, %v3423_v28  ;;  %v3435_v61 = vadd.f32 %v3434_v47, %v3377_v5  ;;  %v3379_v4 = vmul.f32 %v5043_v23, %v3250_v8 }
 0x4e9   :  { %v3420_v13 = vrot.slane %v3419_v15, 1  ;;  %v3430_v49 = vrot.slane %v3429_v56, 2  ;;  %v3440_v16 = vrot.slane %v3378_v37, 4 }
 0x4ea   :  { %v3426_v41 = vrot.slane %v3425_v55, 1  ;;  %v3436_v58 = vrot.slane %v3435_v61, 2  ;;  %v3446_v25 = vrot.slane %v3379_v4, 4  ;;  %v3628_v57 = vsel %vm2372_vm0, %v3415_v59, %v3409_v6  ;;  %v5048_v59 = vld [vmem:[#allocation2 + $0x60] sm:$0xff] }
 0x4eb   :  { %v3421_v44 = vadd.f32 %v3420_v13, %v3419_v15  ;;  %v3431_v22 = vadd.f32 %v3430_v49, %v3429_v56  ;;  %v3441_v54 = vadd.f32 %v3440_v16, %v3378_v37  ;;  %v3255_v30 = vpop.permute.xlu1 %3254  ;;  %v5049_v37 = vld [vmem:[#allocation2 + $0x68] sm:$0xff] }
 0x4ec   :  { %v3427_v11 = vadd.f32 %v3426_v41, %v3425_v55  ;;  %v3437_v18 = vadd.f32 %v3436_v58, %v3435_v61  ;;  %v3447_v1 = vadd.f32 %v3446_v25, %v3379_v4  ;;  %v3260_v29 = vpop.permute.xlu0 %3259  ;;  %v3380_v40 = vmul.f32 %v5044_v45, %v3255_v30 }
 0x4ed   :  { %v3629_v52 = vsel %vm2374_vm1, %v3421_v44, %v3628_v57  ;;  %v3432_v63 = vrot.slane %v3431_v22, 1  ;;  %v3442_v19 = vrot.slane %v3441_v54, 2  ;;  %v3381_v14 = vmul.f32 %v5045_v10, %v3260_v29 }
 0x4ee   :  { %v3438_v50 = vrot.slane %v3437_v18, 1  ;;  %v3448_v3 = vrot.slane %v3447_v1, 2  ;;  %v3452_v12 = vrot.slane %v3380_v40, 4  ;;  %v3630_v33 = vsel %vm2376_vm2, %v3427_v11, %v3629_v52 }
 0x4ef   :  { %v3433_v42 = vadd.f32 %v3432_v63, %v3431_v22  ;;  %v3443_v46 = vadd.f32 %v3442_v19, %v3441_v54  ;;  %v3458_v38 = vrot.slane %v3381_v14, 4  ;;  %v3265_v31 = vpop.permute.xlu1 %3264  ;;  %v5050_v22 = vld [vmem:[#allocation2 + $0x70] sm:$0xff] }
 0x4f0   :  { %v3439_v24 = vadd.f32 %v3438_v50, %v3437_v18  ;;  %v3449_v32 = vadd.f32 %v3448_v3, %v3447_v1  ;;  %v3453_v0 = vadd.f32 %v3452_v12, %v3380_v40  ;;  %v3270_v43 = vpop.permute.xlu0 %3269  ;;  %v3382_v27 = vmul.f32 %v5046_v48, %v3265_v31  ;;  %v5051_v1 = vld [vmem:[#allocation2 + $0x78] sm:$0xff] }
 0x4f1   :  { %v3631_v35 = vsel %vm2378_vm3, %v3433_v42, %v3630_v33  ;;  %v3444_v20 = vrot.slane %v3443_v46, 1  ;;  %v3459_v39 = vadd.f32 %v3458_v38, %v3381_v14  ;;  %v3383_v34 = vmul.f32 %v5047_v21, %v3270_v43 }
 0x4f2   :  { %v3450_v17 = vrot.slane %v3449_v32, 1  ;;  %v3454_v9 = vrot.slane %v3453_v0, 2  ;;  %v3464_v28 = vrot.slane %v3382_v27, 4  ;;  %v3632_v51 = vsel %vm2380_vm4, %v3439_v24, %v3631_v35 }
 0x4f3   :  { %v3445_v5 = vadd.f32 %v3444_v20, %v3443_v46  ;;  %v3460_v26 = vrot.slane %v3459_v39, 2  ;;  %v3470_v36 = vrot.slane %v3383_v34, 4  ;;  %v3275_v7 = vpop.permute.xlu1 %3274 }
 0x4f4   :  { %v3451_v2 = vadd.f32 %v3450_v17, %v3449_v32  ;;  %v3455_v62 = vadd.f32 %v3454_v9, %v3453_v0  ;;  %v3465_v47 = vadd.f32 %v3464_v28, %v3382_v27  ;;  %v3280_v60 = vpop.permute.xlu0 %3279  ;;  %v3384_v15 = vmul.f32 %v5048_v59, %v3275_v7  ;;  %v5052_v7 = vld [vmem:[#allocation2 + $0x88] sm:$0xff] }
 0x4f5   :  { %v3633_v56 = vsel %vm2382_vm6, %v3445_v5, %v3632_v51  ;;  %v3461_v8 = vadd.f32 %v3460_v26, %v3459_v39  ;;  %v3471_v53 = vadd.f32 %v3470_v36, %v3383_v34  ;;  %v3385_v6 = vmul.f32 %v5049_v37, %v3280_v60 }
 0x4f6   :  { %v3456_v55 = vrot.slane %v3455_v62, 1  ;;  %v3466_v61 = vrot.slane %v3465_v47, 2  ;;  %v3476_v23 = vrot.slane %v3384_v15, 4  ;;  %v3634_v4 = vsel %vm2384_vm5, %v3451_v2, %v3633_v56 }
 0x4f7   :  { %v3462_v13 = vrot.slane %v3461_v8, 1  ;;  %v3472_v49 = vrot.slane %v3471_v53, 2  ;;  %v3482_v16 = vrot.slane %v3385_v6, 4  ;;  %v3285_v41 = vpop.permute.xlu1 %3284  ;;  %3660 = vst [vmem:[#allocation7] sm:$0xff] %v3634_v4 }
 0x4f8   :  { %v3457_v58 = vadd.f32 %v3456_v55, %v3455_v62  ;;  %v3467_v25 = vadd.f32 %v3466_v61, %v3465_v47  ;;  %v3477_v57 = vadd.f32 %v3476_v23, %v3384_v15  ;;  %v3290_v44 = vpop.permute.xlu0 %3289  ;;  %v3386_v54 = vmul.f32 %v5050_v22, %v3285_v41  ;;  %v5053_v62 = vld [vmem:[#allocation2 + $0x80] sm:$0xff]  ;;  %v5055_v55 = vld [vmem:[#allocation2 + $0x90] sm:$0xff] }
 0x4f9   :  { %v3463_v30 = vadd.f32 %v3462_v13, %v3461_v8  ;;  %v3473_v11 = vadd.f32 %v3472_v49, %v3471_v53  ;;  %v3483_v18 = vadd.f32 %v3482_v16, %v3385_v6  ;;  %v3387_v29 = vmul.f32 %v5051_v1, %v3290_v44  ;;  %v5054_v53 = vld [vmem:[#allocation2 + $0x98] sm:$0xff] }
 0x4fa   :  { %v3468_v45 = vrot.slane %v3467_v25, 1  ;;  %v3478_v40 = vrot.slane %v3477_v57, 2  ;;  %v3488_v52 = vrot.slane %v3386_v54, 4 }
 0x4fb   :  { %v3474_v63 = vrot.slane %v3473_v11, 1  ;;  %v3484_v19 = vrot.slane %v3483_v18, 2  ;;  %v3494_v10 = vrot.slane %v3387_v29, 4  ;;  %v3635_v12 = vsel %vm2372_vm0, %v3463_v30, %v3457_v58 }
 0x4fc   :  { %v3469_v14 = vadd.f32 %v3468_v45, %v3467_v25  ;;  %v3479_v50 = vadd.f32 %v3478_v40, %v3477_v57  ;;  %v3489_v3 = vadd.f32 %v3488_v52, %v3386_v54  ;;  %v5056_v25 = vld [vmem:[#allocation2 + $0xa8] sm:$0xff]  ;;  %v5057_v54 = vld [vmem:[#allocation2 + $0xa0] sm:$0xff] }
 0x4fd   :  { %v3475_v33 = vadd.f32 %v3474_v63, %v3473_v11  ;;  %v3485_v42 = vadd.f32 %v3484_v19, %v3483_v18  ;;  %v3495_v46 = vadd.f32 %v3494_v10, %v3387_v29  ;;  %v5058_v19 = vld [vmem:[#allocation2 + $0xc8] sm:$0xff] }
 0x4fe   :  { %v3636_v38 = vsel %vm2374_vm1, %v3469_v14, %v3635_v12  ;;  %v3480_v31 = vrot.slane %v3479_v50, 1  ;;  %v3490_v24 = vrot.slane %v3489_v3, 2 }
 0x4ff   :  { %v3486_v32 = vrot.slane %v3485_v42, 1  ;;  %v3496_v0 = vrot.slane %v3495_v46, 2  ;;  %v3637_v35 = vsel %vm2376_vm2, %v3475_v33, %v3636_v38 }
 0x500   :  { %v3481_v43 = vadd.f32 %v3480_v31, %v3479_v50  ;;  %v3491_v48 = vadd.f32 %v3490_v24, %v3489_v3  ;;  %v5059_v3 = vld [vmem:[#allocation2 + $0xb0] sm:$0xff] }
 0x501   :  { %v3487_v27 = vadd.f32 %v3486_v32, %v3485_v42  ;;  %v3497_v20 = vadd.f32 %v3496_v0, %v3495_v46 }
 0x502   :  { %v3638_v39 = vsel %vm2378_vm3, %v3481_v43, %v3637_v35  ;;  %v3492_v21 = vrot.slane %v3491_v48, 1 }
 0x503   :  { %v3498_v34 = vrot.slane %v3497_v20, 1  ;;  %v3639_v28 = vsel %vm2380_vm4, %v3487_v27, %v3638_v39  ;;  %v5061_v39 = vld [vmem:[#allocation2 + $0xc0] sm:$0xff] }
 0x504   :  { %v3493_v17 = vadd.f32 %v3492_v21, %v3491_v48  ;;  %v5060_v48 = vld [vmem:[#allocation2 + $0xd0] sm:$0xff] }
 0x505   :  { %v3499_v9 = vadd.f32 %v3498_v34, %v3497_v20 }
 0x506   :  { %v3640_v51 = vsel %vm2382_vm6, %v3493_v17, %v3639_v28 }
 0x507   :  { %v3641_v5 = vsel %vm2384_vm5, %v3499_v9, %v3640_v51 }
 0x508   :  { %3661 = vst [vmem:[#allocation7 + $0x8] sm:$0xff] %v3641_v5 }
 0x50a   :  { %v3300_v26 = vpop.permute.xlu1 %3299 }
 0x50b   :  { %v3295_v36 = vpop.permute.xlu0 %3294  ;;  %v3389_v2 = vmul.f32 %v5052_v7, %v3300_v26 }
 0x50c   :  { %v3388_v47 = vmul.f32 %v5053_v62, %v3295_v36 }
 0x50d   :  { %v3506_v60 = vrot.slane %v3389_v2, 4 }
 0x50e   :  { %v3500_v59 = vrot.slane %v3388_v47, 4  ;;  %v3310_v15 = vpop.permute.xlu1 %3309 }
 0x50f   :  { %v3507_v56 = vadd.f32 %v3506_v60, %v3389_v2  ;;  %v3305_v8 = vpop.permute.xlu0 %3304  ;;  %v3391_v37 = vmul.f32 %v5054_v53, %v3310_v15  ;;  %v5062_v15 = vld [vmem:[#allocation2 + $0xd8] sm:$0xff] }
 0x510   :  { %v3501_v6 = vadd.f32 %v3500_v59, %v3388_v47  ;;  %v3390_v61 = vmul.f32 %v5055_v55, %v3305_v8 }
 0x511   :  { %v3508_v23 = vrot.slane %v3507_v56, 2  ;;  %v3518_v4 = vrot.slane %v3391_v37, 4 }
 0x512   :  { %v3502_v13 = vrot.slane %v3501_v6, 2  ;;  %v3512_v49 = vrot.slane %v3390_v61, 4  ;;  %v3320_v16 = vpop.permute.xlu1 %3319 }
 0x513   :  { %v3519_v41 = vadd.f32 %v3518_v4, %v3391_v37  ;;  %v3315_v58 = vpop.permute.xlu0 %3314  ;;  %v3393_v57 = vmul.f32 %v5056_v25, %v3320_v16  ;;  %v3509_v44 = vadd.f32 %v3508_v23, %v3507_v56 }
 0x514   :  { %v3513_v22 = vadd.f32 %v3512_v49, %v3390_v61  ;;  %v3392_v30 = vmul.f32 %v5057_v54, %v3315_v58  ;;  %v3503_v11 = vadd.f32 %v3502_v13, %v3501_v6  ;;  %v5063_v6 = vld [vmem:[#allocation2 + $0xe0] sm:$0xff] }
 0x515   :  { %v3530_v18 = vrot.slane %v3393_v57, 4  ;;  %v3520_v29 = vrot.slane %v3519_v41, 2  ;;  %v3510_v14 = vrot.slane %v3509_v44, 1 }
 0x516   :  { %v3514_v1 = vrot.slane %v3513_v22, 2  ;;  %v3524_v45 = vrot.slane %v3392_v30, 4  ;;  %v3340_v40 = vpop.permute.xlu1 %3339  ;;  %v3504_v33 = vrot.slane %v3503_v11, 1 }
 0x517   :  { %v3531_v52 = vadd.f32 %v3530_v18, %v3393_v57  ;;  %v3325_v63 = vpop.permute.xlu0 %3324  ;;  %v3397_v10 = vmul.f32 %v5058_v19, %v3340_v40  ;;  %v3521_v38 = vadd.f32 %v3520_v29, %v3519_v41  ;;  %v3511_v35 = vadd.f32 %v3510_v14, %v3509_v44 }
 0x518   :  { %v3515_v50 = vadd.f32 %v3514_v1, %v3513_v22  ;;  %v3394_v12 = vmul.f32 %v5059_v3, %v3325_v63  ;;  %v3525_v42 = vadd.f32 %v3524_v45, %v3392_v30  ;;  %v3505_v34 = vadd.f32 %v3504_v33, %v3503_v11  ;;  %v5064_v30 = vld [vmem:[#allocation2 + $0xe8] sm:$0xff]  ;;  %v5065_v45 = vld [vmem:[#allocation2 + $0xf0] sm:$0xff] }
 0x519   :  { %v3554_v46 = vrot.slane %v3397_v10, 4  ;;  %v3532_v32 = vrot.slane %v3531_v52, 2  ;;  %v3522_v51 = vrot.slane %v3521_v38, 1 }
 0x51a   :  { %v3536_v31 = vrot.slane %v3394_v12, 4  ;;  %v3345_v24 = vpop.permute.xlu1 %3344  ;;  %v3516_v20 = vrot.slane %v3515_v50, 1  ;;  %v3526_v17 = vrot.slane %v3525_v42, 2  ;;  %v3642_v8 = vsel %vm2372_vm0, %v3511_v35, %v3505_v34 }
 0x51b   :  { %v3555_v0 = vadd.f32 %v3554_v46, %v3397_v10  ;;  %v3335_v43 = vpop.permute.xlu0 %3334  ;;  %v3398_v27 = vmul.f32 %v5060_v48, %v3345_v24  ;;  %v6577_v7 = vadd.f32 %v3532_v32, %v3531_v52  ;;  %v3523_v61 = vadd.f32 %v3522_v51, %v3521_v38  ;;  %v5067_v32 = vld [vmem:[#allocation2 + $0xf8] sm:$0xff] }
 0x51c   :  { %v3396_v21 = vmul.f32 %v5061_v39, %v3335_v43  ;;  %v3537_v5 = vadd.f32 %v3536_v31, %v3394_v12  ;;  %v3517_v60 = vadd.f32 %v3516_v20, %v3515_v50  ;;  %v3527_v53 = vadd.f32 %v3526_v17, %v3525_v42  ;;  %v5066_v42 = vld [vmem:[#allocation2 + $0xb8] sm:$0xff] }
 0x51d   :  { %v3556_v9 = vrot.slane %v3555_v0, 2  ;;  %v3560_v28 = vrot.slane %v3398_v27, 4  ;;  %v3534_v16 = vrot.slane %v6577_v7, 1 }
 0x51e   :  { %v3548_v26 = vrot.slane %v3396_v21, 4  ;;  %v3355_v36 = vpop.permute.xlu1 %3354  ;;  %v3538_v23 = vrot.slane %v3537_v5, 2  ;;  %v3643_v44 = vsel %vm2374_vm1, %v3517_v60, %v3642_v8  ;;  %v3528_v18 = vrot.slane %v3527_v53, 1 }
 0x51f   :  { %v3557_v2 = vadd.f32 %v3556_v9, %v3555_v0  ;;  %v3561_v62 = vadd.f32 %v3560_v28, %v3398_v27  ;;  %v3350_v47 = vpop.permute.xlu0 %3349  ;;  %v3400_v55 = vmul.f32 %v5063_v6, %v3355_v36 }
 0x520   :  { %v3549_v59 = vadd.f32 %v3548_v26, %v3396_v21  ;;  %v3399_v56 = vmul.f32 %v5062_v15, %v3350_v47  ;;  %v3539_v52 = vadd.f32 %v3538_v23, %v3537_v5  ;;  %v3529_v17 = vadd.f32 %v3528_v18, %v3527_v53 }
 0x521   :  { %v3562_v37 = vrot.slane %v3561_v62, 2  ;;  %v3558_v41 = vrot.slane %v3557_v2, 1  ;;  %v3572_v25 = vrot.slane %v3400_v55, 4  ;;  %v3535_v53 = vadd.f32 %v3534_v16, %v6577_v7 }
 0x522   :  { %v3550_v4 = vrot.slane %v3549_v59, 2  ;;  %v3566_v13 = vrot.slane %v3399_v56, 4  ;;  %v3365_v49 = vpop.permute.xlu1 %3364  ;;  %v3540_v5 = vrot.slane %v3539_v52, 1 }
 0x523   :  { %v3563_v58 = vadd.f32 %v3562_v37, %v3561_v62  ;;  %v3360_v57 = vpop.permute.xlu0 %3359  ;;  %v3573_v29 = vadd.f32 %v3572_v25, %v3400_v55  ;;  %v3402_v40 = vmul.f32 %v5065_v45, %v3365_v49  ;;  %v3559_v50 = vadd.f32 %v3558_v41, %v3557_v2 }
 0x524   :  { %v3551_v22 = vadd.f32 %v3550_v4, %v3549_v59  ;;  %v3567_v54 = vadd.f32 %v3566_v13, %v3399_v56  ;;  %v3401_v11 = vmul.f32 %v5064_v30, %v3360_v57  ;;  %v3644_v37 = vsel %vm2376_vm2, %v3523_v61, %v3643_v44 }
 0x525   :  { %v3564_v1 = vrot.slane %v3563_v58, 1  ;;  %v3574_v3 = vrot.slane %v3573_v29, 2  ;;  %v3584_v12 = vrot.slane %v3402_v40, 4  ;;  %v3645_v23 = vsel %vm2378_vm3, %v3529_v17, %v3644_v37 }
 0x526   :  { %v3552_v63 = vrot.slane %v3551_v22, 1  ;;  %v3568_v19 = vrot.slane %v3567_v54, 2  ;;  %v3578_v10 = vrot.slane %v3401_v11, 4  ;;  %v3330_v14 = vpop.permute.xlu1 %3329  ;;  %v3541_v4 = vadd.f32 %v3540_v5, %v3539_v52 }
 0x527   :  { %v3370_v33 = vpop.permute.xlu0 %3369  ;;  %v3395_v46 = vmul.f32 %v5066_v42, %v3330_v14  ;;  %v3565_v43 = vadd.f32 %v3564_v1, %v3563_v58  ;;  %v3575_v48 = vadd.f32 %v3574_v3, %v3573_v29  ;;  %v3585_v27 = vadd.f32 %v3584_v12, %v3402_v40 }
 0x528   :  { %v3553_v38 = vadd.f32 %v3552_v63, %v3551_v22  ;;  %v3569_v31 = vadd.f32 %v3568_v19, %v3567_v54  ;;  %v3579_v24 = vadd.f32 %v3578_v10, %v3401_v11  ;;  %v3403_v0 = vmul.f32 %v5067_v32, %v3370_v33 }
 0x529   :  { %v3542_v35 = vrot.slane %v3395_v46, 4  ;;  %v3576_v9 = vrot.slane %v3575_v48, 1  ;;  %v3586_v28 = vrot.slane %v3585_v27, 2  ;;  %v3646_v61 = vsel %vm2380_vm4, %v3535_v53, %v3645_v23 }
 0x52a   :  { %v3649_v20 = vsel %vm2372_vm0, %v3559_v50, %v3553_v38  ;;  %v3570_v39 = vrot.slane %v3569_v31, 1  ;;  %v3580_v21 = vrot.slane %v3579_v24, 2  ;;  %v3590_v34 = vrot.slane %v3403_v0, 4 }
 0x52b   :  { %v3543_v51 = vadd.f32 %v3542_v35, %v3395_v46  ;;  %v3650_v62 = vsel %vm2374_vm1, %v3565_v43, %v3649_v20  ;;  %v3577_v47 = vadd.f32 %v3576_v9, %v3575_v48  ;;  %v3587_v60 = vadd.f32 %v3586_v28, %v3585_v27 }
 0x52c   :  { %v3571_v26 = vadd.f32 %v3570_v39, %v3569_v31  ;;  %v3581_v36 = vadd.f32 %v3580_v21, %v3579_v24  ;;  %v3591_v2 = vadd.f32 %v3590_v34, %v3403_v0  ;;  %v3647_v7 = vsel %vm2382_vm6, %v3541_v4, %v3646_v61 }
 0x52d   :  { %v3544_v59 = vrot.slane %v3543_v51, 2  ;;  %v3588_v6 = vrot.slane %v3587_v60, 1 }
 0x52e   :  { %v3651_v15 = vsel %vm2376_vm2, %v3571_v26, %v3650_v62  ;;  %v3582_v56 = vrot.slane %v3581_v36, 1  ;;  %v3592_v8 = vrot.slane %v3591_v2, 2 }
 0x52f   :  { %v3545_v55 = vadd.f32 %v3544_v59, %v3543_v51  ;;  %v3652_v41 = vsel %vm2378_vm3, %v3577_v47, %v3651_v15  ;;  %v3589_v58 = vadd.f32 %v3588_v6, %v3587_v60 }
 0x530   :  { %v3583_v13 = vadd.f32 %v3582_v56, %v3581_v36  ;;  %v3593_v49 = vadd.f32 %v3592_v8, %v3591_v2 }
 0x531   :  { %v3546_v25 = vrot.slane %v3545_v55, 1 }
 0x532   :  { %v3653_v57 = vsel %vm2380_vm4, %v3583_v13, %v3652_v41  ;;  %v3594_v22 = vrot.slane %v3593_v49, 1 }
 0x533   :  { %v3547_v44 = vadd.f32 %v3546_v25, %v3545_v55  ;;  %v3654_v54 = vsel %vm2382_vm6, %v3589_v58, %v3653_v57 }
 0x534   :  { %v3595_v16 = vadd.f32 %v3594_v22, %v3593_v49 }
 0x535   :  { %v3648_v30 = vsel %vm2384_vm5, %v3547_v44, %v3647_v7 }
 0x536   :  { %v3655_v11 = vsel %vm2384_vm5, %v3595_v16, %v3654_v54  ;;  %3662 = vst [vmem:[#allocation7 + $0x10] sm:$0xff] %v3648_v30 }
 0x537   :  { %3663 = vst [vmem:[#allocation7 + $0x18] sm:$0xff] %v3655_v11 }
 0x538   :  { %5123 = shalt.err (!%p5120_p6)
}
 0x539   :  { %s5124_s20 = scalar_lea.hbm %s6614_s4, 512 }
 0x53a   :  { %p5125_p7 = scmp.ne.s32.totalorder %s6614_s4, %s5124_s20  ;;  %p5128_p8 = scmp.lt.u32.totalorder %s5124_s20, %s6614_s4 }
 0x53c   :  { %p5130_p9 = pnand %p5128_p8, %p5125_p7 }
 0x53e   :  { %5133 = shalt.err (!%p5130_p9)
}
 0x53f   :  { %3675 = dma.vmem_to_hbm [thread:$0]  %s3670_s16, 512, %s6614_s4, [#allocation4], %s5141_s25, %s5141_s25, %s5142_s26  }
 0x540   :  { %5138 = dma.done.wait [#allocation4], 512  }
 0x541   :  { %5139 = vsyncadd [#allocation4], 4294966784 }
 0x542   :  { %3679 = vsyncpa [#allocation3], 1 }
 0x543   :  { %3680 = vsyncpa [#allocation6], 1 }
 0x544   :  { %3681 = vsyncpa [#allocation4], 1 }

</bundles_post_ra>
